<compile_context>
chip_gen: v7x
topology: tpu7x:2x2x1
jax: 0.10.0
libtpu: 0.0.40
codegen_flags: <defaults>
</compile_context>

<pallas_src>
import functools

import jax
import jax.numpy as jnp
from jax.experimental import pallas as pl
from jax.experimental.pallas import tpu as pltpu

HIDDEN = 256
H_CONST = 0.2   # PsiNet(h=0.2)


def _psinet_kernel_body(r_ref, side_ref, w2_ref, out_ref, *, compute_dtype):
    """side_ref columns: 0-1 = W1 (out,in), 2 = b1, 3 = b2, 4 = W3 row, 5 = b3."""
    cdt = compute_dtype

    r = r_ref[...]                                        # (1, tm) f32, batch on lanes
    r_c = jnp.clip(r, 0.001, 10.0)                        # torch.clamp(r, 0.001, 10.0)
    inv = 1.0 / (r_c * r_c + H_CONST * H_CONST)           # 1 / (r^2 + h^2)

    w1_r = side_ref[:, 0:1].astype(cdt)                   # (256, 1)
    w1_i = side_ref[:, 1:2].astype(cdt)
    b1 = side_ref[:, 2:3].astype(cdt)
    b2 = side_ref[:, 3:4]                                 # f32 (added to f32 accum)
    w3 = side_ref[:, 4:5].astype(cdt)
    b3 = side_ref[0:1, 5:6]                               # (1, 1) f32

    # Layer 1: Linear(2, 256). K=2 is MXU-degenerate -> two VPU outer-product
    # broadcasts (256,1)*(1,tm). bf16 on v6e/v7x, f32 on v5e.
    pre1 = w1_r * r_c.astype(cdt) + w1_i * inv.astype(cdt) + b1       # (256, tm)
    h1 = jnp.tanh(pre1).astype(jnp.bfloat16)                          # MXU operand

    # Layer 2: Linear(256, 256) on the MXU, bf16 x bf16 operands, f32 accum.
    pre2 = jnp.dot(w2_ref[...], h1, preferred_element_type=jnp.float32) + b2
    h2 = jnp.tanh(pre2.astype(cdt))                                   # (256, tm)

    # Layer 3: Linear(256, 1). Output dim 1 -> VPU multiply + sublane reduce,
    # accumulated in f32.
    z = jnp.sum((w3 * h2).astype(jnp.float32), axis=0, keepdims=True) + b3  # (1, tm)

    # Softplus, numerically stable log1p(exp(z)), f32.
    out_ref[...] = jnp.where(z > 20.0, z, jnp.log1p(jnp.exp(jnp.minimum(z, 20.0))))


_KERNELS = {
    True: functools.partial(_psinet_kernel_body, compute_dtype=jnp.bfloat16),
    False: functools.partial(_psinet_kernel_body, compute_dtype=jnp.float32),
}


def _round_up(x, m):
    return ((x + m - 1) // m) * m


def _default_use_bf16():
    """bf16 VPU/EUP element-wise path only pays off on v6e and later."""
    try:
        kind = jax.devices()[0].device_kind.lower()
    except Exception:
        return False
    return not any(tag in kind for tag in ("v2", "v3", "v4", "v5"))


def psinet_forward(r, params, *, tm=2048, use_bf16_elementwise=None):
    """r: (N,) or (N, 1) float32. Returns (N,) float32 (matches torch .squeeze())."""
    side, w2 = params
    if use_bf16_elementwise is None:
        use_bf16_elementwise = _default_use_bf16()

    r_flat = jnp.asarray(r, jnp.float32).reshape(-1)
    n = r_flat.shape[0]

    # Lane tile over the batch: multiple of 256 (full MXU passes on v6e/v7x,
    # 2x128 on v5e), capped at tm, and chosen so the grid has >= 2 steps
    # whenever possible (keeps both v7x TensorCores busy for small batches).
    tm_eff = min(tm, max(256, _round_up(pl.cdiv(n, 2), 256)))
    n_pad = _round_up(max(n, 1), tm_eff)
    grid = (n_pad // tm_eff,)

    # Pad value is arbitrary (clamped in-kernel); padded lanes are sliced off.
    r_row = jnp.pad(r_flat, (0, n_pad - n), constant_values=1.0).reshape(1, n_pad)

    cost = pl.CostEstimate(
        flops=int(n_pad * (2 * HIDDEN * HIDDEN + 6 * HIDDEN)),
        transcendentals=int(n_pad * (2 * HIDDEN + 1)),
        bytes_accessed=int(8 * n_pad + HIDDEN * HIDDEN * 2 + HIDDEN * 8 * 4),
    )

    out = pl.pallas_call(
        _KERNELS[bool(use_bf16_elementwise)],
        out_shape=jax.ShapeDtypeStruct((1, n_pad), jnp.float32),
        grid_spec=pltpu.PrefetchScalarGridSpec(
            num_scalar_prefetch=0,
            grid=grid,
            in_specs=[
                pl.BlockSpec((1, tm_eff), lambda i: (0, i)),           # r (lane-dense)
                pl.BlockSpec((HIDDEN, 8), lambda i: (0, 0)),           # packed side params (f32)
                pl.BlockSpec((HIDDEN, HIDDEN), lambda i: (0, 0)),      # W2 (out,in) bf16
            ],
            out_specs=pl.BlockSpec((1, tm_eff), lambda i: (0, i)),
        ),
        compiler_params=pltpu.CompilerParams(
            dimension_semantics=("parallel",),   # megacore / v7x 2-TC sharding
        ),
        cost_estimate=cost,
    )(r_row, side, w2)
    return out[0, :n]   # drop padding; matches torch .squeeze()


def init_params(key):
    """nn.Linear-style init (uniform +/- 1/sqrt(fan_in)) packed into the
    kernel layout: side = (256, 8) f32 [W1 r-col, W1 inv-col, b1, b2, w3, b3],
    w2 = (256, 256) bf16 in PyTorch (out_features, in_features) layout."""
    k1, k2, k3, k4, k5, k6 = jax.random.split(key, 6)

    def lin(kw, kb, fan_in, fan_out):
        bound = 1.0 / (fan_in ** 0.5)
        w = jax.random.uniform(kw, (fan_out, fan_in), jnp.float32, -bound, bound)
        b = jax.random.uniform(kb, (fan_out,), jnp.float32, -bound, bound)
        return w, b

    w1, b1 = lin(k1, k2, 2, HIDDEN)          # (256, 2), (256,)
    w2, b2 = lin(k3, k4, HIDDEN, HIDDEN)     # (256, 256), (256,)
    w3, b3 = lin(k5, k6, HIDDEN, 1)          # (1, 256), (1,)

    side = jnp.zeros((HIDDEN, 8), jnp.float32)
    side = side.at[:, 0:2].set(w1)
    side = side.at[:, 2].set(b1)
    side = side.at[:, 3].set(b2)
    side = side.at[:, 4].set(w3[0])
    side = side.at[:, 5].set(b3[0])          # b3 broadcast down the column
    return side, w2.astype(jnp.bfloat16)     # bf16 MXU operand (f32 accum in-kernel)


def psinet_reference(r, params):
    """Pure-JAX f32 reference (uses the stored bf16-rounded W2 so only the
    kernel's bf16 activation/MXU path contributes to the comparison error)."""
    side, w2 = params
    w1 = side[:, 0:2]
    b1 = side[:, 2]
    b2 = side[:, 3]
    w3 = side[:, 4]
    b3 = side[0, 5]
    r_col = jnp.asarray(r, jnp.float32).reshape(-1, 1)
    r_c = jnp.clip(r_col, 0.001, 10.0)
    feat = jnp.concatenate([r_c, 1.0 / (r_c ** 2 + H_CONST ** 2)], axis=-1)   # (N, 2)
    h1 = jnp.tanh(feat @ w1.T + b1)
    h2 = jnp.tanh(h1 @ w2.astype(jnp.float32).T + b2)
    z = h2 @ w3 + b3                                                          # (N,)
    return jax.nn.softplus(z)


if __name__ == "__main__":
    key = jax.random.PRNGKey(0)
    kp, kr = jax.random.split(key)
    params = init_params(kp)

    # Small, non-tile-aligned batch: exercises pad/slice and the >=2-step grid
    # selection (N=300 -> tm_eff=256, n_pad=512, grid=(2,)).
    N = 300
    r = jax.random.uniform(kr, (N, 1), jnp.float32, 0.0, 5.0)

    out = jax.block_until_ready(psinet_forward(r, params))
    ref = psinet_reference(r, params)

    assert out.shape == (N,)
    # bf16 MXU operands + (on v6e/v7x) bf16 tanh/VPU path -> widened tolerance.
    assert jnp.allclose(out, ref, atol=3e-2, rtol=3e-2), (
        f"mismatch vs reference: max abs err {float(jnp.max(jnp.abs(out - ref)))}")
    print("KERNEL_OK")
</pallas_src>

<mosaic_0001>
module attributes {stable_mosaic.version = 11 : i64} {
  func.func @_psinet_kernel_body(%arg0: i32, %arg1: memref<1x256xf32, #tpu.memory_space<vmem>>, %arg2: memref<256x8xf32, #tpu.memory_space<vmem>>, %arg3: memref<256x256xbf16, #tpu.memory_space<vmem>>, %arg4: memref<1x256xf32, #tpu.memory_space<vmem>>) attributes {dimension_semantics = [#tpu.dimension_semantics<parallel>], iteration_bounds = array<i64: 2>, scalar_prefetch = 0 : i64, scratch_operands = 0 : i64, tpu.core_type = #tpu.core_type<tc>, window_params = [{transform_indices = @transform_0, window_bounds = array<i64: 1, 256>}, {pipeline_mode = #tpu.pipeline_mode<synchronous>, transform_indices = @transform_1, window_bounds = array<i64: 256, 8>}, {pipeline_mode = #tpu.pipeline_mode<synchronous>, transform_indices = @transform_2, window_bounds = array<i64: 256, 256>}, {transform_indices = @transform_3, window_bounds = array<i64: 1, 256>}]} {
    %c0 = arith.constant 0 : index
    %c0_0 = arith.constant 0 : index
    %0 = vector.load %arg1[%c0, %c0_0] : memref<1x256xf32, #tpu.memory_space<vmem>>, vector<1x256xf32>
    %cst = arith.constant 1.000000e-03 : f32
    %cst_1 = arith.constant 1.000000e+01 : f32
    %1 = vector.broadcast %cst : f32 to vector<1x256xf32>
    %2 = arith.maximumf %1, %0 : vector<1x256xf32>
    %3 = vector.broadcast %cst_1 : f32 to vector<1x256xf32>
    %4 = arith.minimumf %3, %2 : vector<1x256xf32>
    %5 = arith.mulf %4, %4 : vector<1x256xf32>
    %cst_2 = arith.constant 4.000000e-02 : f32
    %6 = vector.broadcast %cst_2 : f32 to vector<1x256xf32>
    %7 = arith.addf %5, %6 : vector<1x256xf32>
    %cst_3 = arith.constant 1.000000e+00 : f32
    %8 = vector.broadcast %cst_3 : f32 to vector<1x256xf32>
    %9 = arith.divf %8, %7 : vector<1x256xf32>
    %c0_4 = arith.constant 0 : index
    %c0_5 = arith.constant 0 : index
    %10 = vector.load %arg2[%c0_4, %c0_5] : memref<256x8xf32, #tpu.memory_space<vmem>>, vector<256x1xf32>
    %11 = arith.truncf %10 : vector<256x1xf32> to vector<256x1xbf16>
    %c0_6 = arith.constant 0 : index
    %c1 = arith.constant 1 : index
    %12 = vector.load %arg2[%c0_6, %c1] : memref<256x8xf32, #tpu.memory_space<vmem>>, vector<256x1xf32>
    %13 = arith.truncf %12 : vector<256x1xf32> to vector<256x1xbf16>
    %c0_7 = arith.constant 0 : index
    %c2 = arith.constant 2 : index
    %14 = vector.load %arg2[%c0_7, %c2] : memref<256x8xf32, #tpu.memory_space<vmem>>, vector<256x1xf32>
    %15 = arith.truncf %14 : vector<256x1xf32> to vector<256x1xbf16>
    %c0_8 = arith.constant 0 : index
    %c3 = arith.constant 3 : index
    %16 = vector.load %arg2[%c0_8, %c3] : memref<256x8xf32, #tpu.memory_space<vmem>>, vector<256x1xf32>
    %c0_9 = arith.constant 0 : index
    %c4 = arith.constant 4 : index
    %17 = vector.load %arg2[%c0_9, %c4] : memref<256x8xf32, #tpu.memory_space<vmem>>, vector<256x1xf32>
    %18 = arith.truncf %17 : vector<256x1xf32> to vector<256x1xbf16>
    %c0_10 = arith.constant 0 : index
    %c5 = arith.constant 5 : index
    %19 = vector.load %arg2[%c0_10, %c5] : memref<256x8xf32, #tpu.memory_space<vmem>>, vector<1x1xf32>
    %20 = arith.truncf %4 : vector<1x256xf32> to vector<1x256xbf16>
    %21 = vector.broadcast %11 : vector<256x1xbf16> to vector<256x256xbf16>
    %22 = vector.broadcast %20 : vector<1x256xbf16> to vector<256x256xbf16>
    %23 = arith.mulf %21, %22 : vector<256x256xbf16>
    %24 = arith.truncf %9 : vector<1x256xf32> to vector<1x256xbf16>
    %25 = vector.broadcast %13 : vector<256x1xbf16> to vector<256x256xbf16>
    %26 = vector.broadcast %24 : vector<1x256xbf16> to vector<256x256xbf16>
    %27 = arith.mulf %25, %26 : vector<256x256xbf16>
    %28 = arith.addf %23, %27 : vector<256x256xbf16>
    %29 = vector.broadcast %15 : vector<256x1xbf16> to vector<256x256xbf16>
    %30 = arith.addf %28, %29 : vector<256x256xbf16>
    %31 = math.tanh %30 : vector<256x256xbf16>
    %c0_11 = arith.constant 0 : index
    %c0_12 = arith.constant 0 : index
    %32 = vector.load %arg3[%c0_11, %c0_12] : memref<256x256xbf16, #tpu.memory_space<vmem>>, vector<256x256xbf16>
    %cst_13 = arith.constant dense<0.000000e+00> : vector<256x256xf32>
    %33 = tpu.matmul %32, %31, %cst_13 {dimension_numbers = #tpu.dot_dimension_numbers<[1], [0], [0], [1], [0, 0, 1, 1], [], []>} : vector<256x256xbf16>, vector<256x256xbf16>, vector<256x256xf32> -> vector<256x256xf32>
    %34 = vector.broadcast %16 : vector<256x1xf32> to vector<256x256xf32>
    %35 = arith.addf %33, %34 : vector<256x256xf32>
    %36 = arith.truncf %35 : vector<256x256xf32> to vector<256x256xbf16>
    %37 = math.tanh %36 : vector<256x256xbf16>
    %38 = vector.broadcast %18 : vector<256x1xbf16> to vector<256x256xbf16>
    %39 = arith.mulf %38, %37 : vector<256x256xbf16>
    %40 = arith.extf %39 : vector<256x256xbf16> to vector<256x256xf32>
    %cst_14 = arith.constant dense<0.000000e+00> : vector<256xf32>
    %41 = vector.multi_reduction <add>, %40, %cst_14 [0] : vector<256x256xf32> to vector<256xf32>
    %42 = vector.shape_cast %41 : vector<256xf32> to vector<1x256xf32>
    %43 = vector.broadcast %19 : vector<1x1xf32> to vector<1x256xf32>
    %44 = arith.addf %42, %43 : vector<1x256xf32>
    %cst_15 = arith.constant 2.000000e+01 : f32
    %45 = vector.broadcast %cst_15 : f32 to vector<1x256xf32>
    %46 = arith.cmpf ogt, %44, %45 : vector<1x256xf32>
    %cst_16 = arith.constant 2.000000e+01 : f32
    %47 = vector.broadcast %cst_16 : f32 to vector<1x256xf32>
    %48 = arith.minimumf %44, %47 : vector<1x256xf32>
    %49 = math.exp %48 : vector<1x256xf32>
    %50 = math.log1p %49 : vector<1x256xf32>
    %51 = arith.select %46, %44, %50 : vector<1x256xi1>, vector<1x256xf32>
    %c0_17 = arith.constant 0 : index
    %c0_18 = arith.constant 0 : index
    %52 = vector.load %arg4[%c0_17, %c0_18] : memref<1x256xf32, #tpu.memory_space<vmem>>, vector<1x256xf32>
    tpu.vector_store %arg4[%c0_17, %c0_18], %51 {strides = array<i32>} : memref<1x256xf32, #tpu.memory_space<vmem>>, vector<1x256xf32>,
    return
  }
  func.func @transform_0(%arg0: i32) -> (i32, i32) {
    %c0_i32 = arith.constant 0 : i32
    %c0_i32_0 = arith.constant 0 : i32
    return %c0_i32, %arg0 : i32, i32
  }
  func.func @transform_1(%arg0: i32) -> (i32, i32) {
    %c0_i32 = arith.constant 0 : i32
    %c0_i32_0 = arith.constant 0 : i32
    %c0_i32_1 = arith.constant 0 : i32
    return %c0_i32, %c0_i32_0 : i32, i32
  }
  func.func @transform_2(%arg0: i32) -> (i32, i32) {
    %c0_i32 = arith.constant 0 : i32
    %c0_i32_0 = arith.constant 0 : i32
    %c0_i32_1 = arith.constant 0 : i32
    return %c0_i32, %c0_i32_0 : i32, i32
  }
  func.func @transform_3(%arg0: i32) -> (i32, i32) {
    %c0_i32 = arith.constant 0 : i32
    %c0_i32_0 = arith.constant 0 : i32
    return %c0_i32, %arg0 : i32, i32
  }
}

</mosaic_0001>

<bundles_post_ra>
// kernel: tpu_custom_call.1
= control target key start
LH: loop header
LB: loop body
LE: loop exit
PB: predicated region body
PF: predicated region fallthrough
CT: control target
= control target key end

     0   :  { %8 = vsyncpa [#allocation3], 0  ;;  %s3001_s0 = inlined_call_operand.vmem [shape: f32[1,512], index: 0, kind: input, shape index: {}]   ;;  %s3002_s1 = inlined_call_operand.vmem [shape: f32[256,8], index: 1, kind: input, shape index: {}]   ;;  %s3003_s2 = inlined_call_operand.vmem [shape: bf16[256,256], index: 2, kind: input, shape index: {}]   ;;  %s3004_s3 = inlined_call_operand.hbm [shape: f32[1,512], index: 3, kind: output, shape index: {}]  }
   0x1   :  { %10 = vsyncpa [#allocation3 + $0x1], 0  ;;  %s2072_s12 = smov 0   ;;  %s2074_s13 = smov 0  }
   0x2   :  { %s2076_s14 = smov 0   ;;  %s2078_s15 = smov 0  }
   0x3 LB: > { %s2093_s16 = sadd.s32 4294967295, %s2042_s15   ;;  %s1619_s17 = sadd.s32 4294967294, %s2042_s15   ;;  %s2042_s15 = sphi %s2078_s15, %s3068_s15   ;;  %s2038_s14 = sphi %s2076_s14, %s3067_s14   ;;  %s2034_s13 = sphi %s2074_s13, %s3066_s13   ;;  %s2030_s12 = sphi %s2072_s12, %s3065_s12  }
   0x4   : > { %s2097_s18 = sadd.s32 1, %s2042_s15   ;;  %s91_s19 = sadd.s32 1, %s2038_s14 }
   0x5   : > { %s88_s20 = ssub.s32 %s2042_s15, %s2097_s18  ;;  %p101_p0 = scmp.ne.s32.totalorder %s2038_s14, %s2034_s13 }
   0x6   : > { %p89_p1 = scmp.eq.s32.totalorder %s88_s20, 0  ;;  %p102_p2 = scmp.eq.s32.totalorder %s2093_s16, 1 }
   0x7   : > { %p107_p3 = scmp.ne.s32.totalorder %s2034_s13, %s2030_s12  ;;  %p108_p4 = scmp.eq.s32.totalorder %s1619_s17, 1 }
   0x8   : > { %s2108_s21 = scalar_select %p89_p1, %s2038_s14, %s91_s19  }
   0x9   : > { %p2110_p5 = por %p102_p2, %p101_p0  ;;  %p2114_p6 = por %p108_p4, %p107_p3 }
   0xa   : > { %p1622_p7 = scmp.ge.s32.totalorder %s2042_s15, 1  ;;  %p140_p8 = scmp.lt.s32.totalorder %s2042_s15, 3 }
   0xc   : > { %p141_p9 = pnand %p1622_p7, %p140_p8 }
   0xe   : > { %144 = sbr.rel (%p141_p9) target bundleno = 703 (0x2bf), region = 32 }
  0x15   : > { %v2123_v0 = vld [vmem:[%s3002_s1 + $0x10] sm:$0xff]  ;;  %v2128_v1 = vld [vmem:[%s3002_s1 + $0x18] sm:$0xff]  ;;  %v2133_v2 = vld [vmem:[%s3002_s1] sm:$0xff]  ;;  %v3012_v3 = vmov 0   ;;  %v2045_v4 = vmov 1   ;;  %v3006_v13 = vmov 2   ;;  %v3005_v53 = vlaneseq }
  0x16   : > { %1743 = vset.pattern.permute.xlu1 %v3012_v3  ;;  %1741 = vset.pattern.permute.xlu0 %v2045_v4  ;;  %v2139_v5 = vpack.c.bf16 %v2128_v1, %v2123_v0  ;;  %v2144_v6 = vld [vmem:[%s3002_s1 + $0x8] sm:$0xff]  ;;  %v2155_v8 = vld [vmem:[%s3002_s1 + $0x20] sm:$0xff]  ;;  %v2173_v11 = vld [vmem:[%s3002_s1 + $0x30] sm:$0xff]  ;;  %s1624_s26 = sshll.u32 %s2093_s16, 1  ;;  %s160_s5 = sand.u32 1, %s2034_s13  }
  0x17   : > { %v2148_v7 = vpack.c.bf16 %v2144_v6, %v2133_v2  ;;  %v2160_v9 = vld [vmem:[%s3002_s1 + $0x28] sm:$0xff]  ;;  %v2178_v12 = vld [vmem:[%s3002_s1 + $0x38] sm:$0xff]  ;;  %v2197_v15 = vld [vmem:[%s3002_s1 + $0x70] sm:$0xff]  ;;  %p164_p10 = scmp.lt.s32.totalorder %s1624_s26, 3  ;;  %v2407_v54 = vshrl.u32 %v3005_v53, 7  ;;  %s1662_s7 = sshll.u32 %s2093_s16, 5 }
  0x18   : > { %245 = vperm.xlu1 %1743, %v2139_v5   ;;  %v2168_v10 = vpack.c.bf16 %v2160_v9, %v2155_v8  ;;  %v2185_v14 = vpack.c.bf16 %v2178_v12, %v2173_v11  ;;  %v2202_v16 = vld [vmem:[%s3002_s1 + $0x78] sm:$0xff]  ;;  %v2208_v17 = vld [vmem:[%s3002_s1 + $0x40] sm:$0xff]  ;;  %v2213_v18 = vld [vmem:[%s3002_s1 + $0x48] sm:$0xff]  ;;  %s2959_s17 = scalar_lea.hbm %s3004_s3, %s1662_s7  ;;  %s1549_s19 = scalar_lea.sflag [#allocation3], %s160_s5 }
  0x19   : > { %378 = vperm.xlu0 %1741, %v2148_v7   ;;  %v2217_v19 = vpack.c.bf16 %v2202_v16, %v2197_v15  ;;  %v2223_v20 = vld [vmem:[%s3002_s1 + $0x80] sm:$0xff]  ;;  %v2228_v21 = vld [vmem:[%s3002_s1 + $0x88] sm:$0xff]  ;;  %v2233_v22 = vpack.c.bf16 %v2213_v18, %v2208_v17  ;;  %v2244_v24 = vld [vmem:[%s3002_s1 + $0x50] sm:$0xff]  ;;  %s3070_s26 = smov (!%p164_p10, %s1624_s26), 3  ;;  %3034 = vst [vmem:[#allocation15_spill] sm:$0xff] %v2407_v54  ;;  %v228_v58 = vsub.s32 0, %v2407_v54 }
  0x1a   : > { %v2238_v23 = vpack.c.bf16 %v2228_v21, %v2223_v20  ;;  %v2249_v25 = vld [vmem:[%s3002_s1 + $0x58] sm:$0xff]  ;;  %v2260_v27 = vld [vmem:[%s3002_s1 + $0x60] sm:$0xff]  ;;  %v2265_v28 = vld [vmem:[%s3002_s1 + $0x68] sm:$0xff]  ;;  %s166_s6 = scalar_lea.vmem %s3001_s0, %s3070_s26  ;;  %v232_v59 = vsub.s32 1, %v2407_v54  ;;  %s2051_s16 = smov [#allocation2]  }
  0x1b   : > { %v2255_v26 = vpack.c.bf16 %v2249_v25, %v2244_v24  ;;  %v2273_v29 = vpack.c.bf16 %v2265_v28, %v2260_v27  ;;  %v2278_v30 = vld [vmem:[%s3002_s1 + $0xa0] sm:$0xff]  ;;  %v2283_v31 = vld [vmem:[%s3002_s1 + $0xa8] sm:$0xff]  ;;  %v2295_v33 = vld [vmem:[%s3002_s1 + $0xb0] sm:$0xff]  ;;  %s1984_s24 = sshll.u32 %s2051_s16, 4  ;;  %s1985_s24 = int_to_ptr.vmem [resolvable:$false] %s1984_s24 }
  0x1c   : > { %1744 = vset.pattern.permute.xlu1 %v2045_v4  ;;  %3024 = vst [vmem:[#allocation5_spill] sm:$0xff] %v2238_v23  ;;  %v2290_v32 = vpack.c.bf16 %v2283_v31, %v2278_v30  ;;  %v2300_v34 = vld [vmem:[%s3002_s1 + $0xb8] sm:$0xff]  ;;  %v2318_v36 = vld [vmem:[%s3002_s1 + $0xc0] sm:$0xff]  ;;  %v2323_v37 = vld [vmem:[%s3002_s1 + $0xc8] sm:$0xff]  ;;  %s1986_s25 = scalar_lea.vmem %s1985_s24, 64 }
  0x1d   : > { %382 = vperm.xlu1 %1744, %v2139_v5   ;;  %1742 = vset.pattern.permute.xlu0 %v3012_v3  ;;  %v2306_v35 = vpack.c.bf16 %v2300_v34, %v2295_v33  ;;  %v2329_v38 = vpack.c.bf16 %v2323_v37, %v2318_v36  ;;  %v2334_v39 = vld [vmem:[%s3002_s1 + $0xd0] sm:$0xff]  ;;  %v2339_v40 = vld [vmem:[%s3002_s1 + $0xd8] sm:$0xff]  ;;  %v169_v48 = vld [vmem:[%s166_s6] sm:$0x3]  ;;  %s1623_s6 = sshll.u32 %s160_s5, 1 }
  0x1e   : > { %240 = vperm.xlu0 %1742, %v2148_v7   ;;  %3025 = vst [vmem:[#allocation6_spill] sm:$0xff] %v2290_v32  ;;  %3028 = vst [vmem:[#allocation9_spill] sm:$0xff] %v2339_v40  ;;  %v2346_v41 = vpack.c.bf16 %v2339_v40, %v2334_v39  ;;  %v2354_v42 = vld [vmem:[%s3002_s1 + $0x90] sm:$0xff]  ;;  %v2359_v43 = vld [vmem:[%s3002_s1 + $0x98] sm:$0xff]  ;;  %v170_v49 = vmax.f32 %v169_v48, 0.001 }
  0x1f   : > { %3026 = vst [vmem:[#allocation7_spill] sm:$0xff] %v2306_v35  ;;  %3027 = vst [vmem:[#allocation8_spill] sm:$0xff] %v2329_v38  ;;  %v2368_v44 = vpack.c.bf16 %v2359_v43, %v2354_v42  ;;  %v2373_v45 = vld [vmem:[%s3002_s1 + $0xf0] sm:$0xff]  ;;  %v2378_v46 = vld [vmem:[%s3002_s1 + $0xf8] sm:$0xff]  ;;  %s162_s8 = scalar_lea.vmem [#allocation2], %s1623_s6 }
  0x20   : > { %3029 = vst [vmem:[#allocation10_spill] sm:$0xff] %v2346_v41  ;;  %3031 = vst [vmem:[#allocation12_spill] sm:$0xff] %v2373_v45  ;;  %v2385_v47 = vpack.c.bf16 %v2378_v46, %v2373_v45  ;;  %v171_v50 = vmin.f32 %v170_v49, 10.0  ;;  %v2412_v56 = vld [vmem:[%s3002_s1 + $0xe0] sm:$0xff]  ;;  %v2417_v57 = vld [vmem:[%s3002_s1 + $0xe8] sm:$0xff]  ;;  %s1563_s9 = sshll.u32 %s162_s8, 4  ;;  %s2961_s9 = int_to_ptr.vmem [resolvable:$true] %s1563_s9 }
  0x21   : > { %1745 = vset.pattern.permute.xlu1 %v3006_v13  ;;  %3030 = vst [vmem:[#allocation11_spill] sm:$0xff] %v2368_v44  ;;  %3032 = vst [vmem:[#allocation13_spill] sm:$0xff] %v2378_v46  ;;  %v2425_v60 = vpack.c.bf16 %v2417_v57, %v2412_v56  ;;  %v3038_v46 = vmov 0   ;;  %s1980_s20 = scalar_lea.vmem %s2961_s9, 32  ;;  %p1987_p0 = scmp.lt.s32.totalorder %s2961_s9, %s1985_s24 }
  0x22   : > { %520 = vperm.xlu1 %1745, %v2148_v7   ;;  %250 = vperm.xlu0 %1742, %v2168_v10   ;;  %3033 = vst [vmem:[#allocation14_spill] sm:$0xff] %v2385_v47  ;;  %v172_v51 = vmul.f32 %v171_v50, %v171_v50  ;;  %3035 = vst [vmem:[#allocation16_spill] sm:$0xff] %v2412_v56  ;;  %v229_v63 = vrot.slane %v171_v50, %v228_v58  ;;  %p1981_p11 = scmp.ne.s32.totalorder %s2961_s9, %s1980_s20  ;;  %p1988_p1 = scmp.lt.s32.totalorder %s1986_s25, %s1980_s20 }
  0x23   : > { %3036 = vst [vmem:[#allocation17_spill] sm:$0xff] %v2417_v57  ;;  %3037 = vst [vmem:[#allocation18_spill] sm:$0xff] %v2425_v60  ;;  %v233_v48 = vrot.slane %v171_v50, %v232_v59 }
  0x24   : > { %v173_v52 = vadd.f32 0.04, %v172_v51  ;;  %p1982_p12 = pnand %p1981_p11, %p2110_p5  ;;  %p1989_p2 = por %p1988_p1, %p1987_p0 }
  0x25   : > { %v237_v53 = vpack.c.bf16 %v233_v48, %v233_v48 }
  0x26   : > { %1746 = vset.pattern.permute.xlu1 %v2045_v4  ;;  %255 = vperm.xlu0 %1742, %v2185_v14   ;;  %1842 = vrcp.f32 %v173_v52  ;;  %v236_v52 = vpack.c.bf16 %v229_v63, %v229_v63  ;;  %p1983_p13 = pneg %p1982_p12 }
  0x27   : > { %386 = vperm.xlu1 %1746, %v2168_v10  }
  0x28   : > { %p1990_p3 = pnand %p1989_p2, %p1983_p13 }
  0x2a   : > { %1749 = vset.pattern.permute.xlu0 %v3006_v13 }
  0x2b   : > { %1747 = vset.pattern.permute.xlu1 %v3006_v13  ;;  %528 = vperm.xlu0 %1749, %v2168_v10  }
  0x2c   : > { %524 = vperm.xlu1 %1747, %v2139_v5  }
  0x2f   : > { %532 = vperm.xlu0 %1749, %v2185_v14  }
  0x30   : > { %1748 = vset.pattern.permute.xlu1 %v2045_v4  ;;  %v1843_v55 = vpop.eup %1842 }
  0x31   : > { %390 = vperm.xlu1 %1748, %v2185_v14   ;;  %v368_v61 = vrot.slane %v1843_v55, %v228_v58  ;;  %v372_v62 = vrot.slane %v1843_v55, %v232_v59 }
  0x33   : > { %548 = vperm.xlu0 %1749, %v2217_v19   ;;  %v375_v49 = vpack.c.bf16 %v368_v61, %v368_v61  ;;  %v376_v51 = vpack.c.bf16 %v372_v62, %v372_v62 }
  0x35   : > { %1750 = vset.pattern.permute.xlu1 %v3012_v3  ;;  %v449_v54 = vpack.i.b16 %v376_v51, %v376_v51 }
  0x36   : > { %260 = vperm.xlu1 %1750, %v2233_v22  }
  0x37   : > { %552 = vperm.xlu0 %1749, %v2238_v23  }
  0x3a   : > { %1751 = vset.pattern.permute.xlu1 %v2045_v4 }
  0x3b   : > { %394 = vperm.xlu1 %1751, %v2233_v22   ;;  %1761 = vset.pattern.permute.xlu0 %v2045_v4 }
  0x3c   : > { %398 = vperm.xlu0 %1761, %v2255_v26  }
  0x3f   : > { %1752 = vset.pattern.permute.xlu1 %v3012_v3 }
  0x40   : > { %265 = vperm.xlu1 %1752, %v2255_v26   ;;  %402 = vperm.xlu0 %1761, %v2273_v29  }
  0x44   : > { %1753 = vset.pattern.permute.xlu1 %v3006_v13  ;;  %418 = vperm.xlu0 %1761, %v2290_v32  }
  0x45   : > { %536 = vperm.xlu1 %1753, %v2233_v22  }
  0x48   : > { %422 = vperm.xlu0 %1761, %v2306_v35  }
  0x49   : > { %1754 = vset.pattern.permute.xlu1 %v3012_v3 }
  0x4a   : > { %270 = vperm.xlu1 %1754, %v2273_v29  }
  0x4c   : > { %1765 = vset.pattern.permute.xlu0 %v3012_v3 }
  0x4d   : > { %275 = vperm.xlu0 %1765, %v2217_v19  }
  0x4e   : > { %1755 = vset.pattern.permute.xlu1 %v3006_v13 }
  0x4f   : > { %540 = vperm.xlu1 %1755, %v2255_v26  }
  0x51   : > { %280 = vperm.xlu0 %1765, %v2238_v23  }
  0x53   : > { %1756 = vset.pattern.permute.xlu1 %v2045_v4 }
  0x54   : > { %406 = vperm.xlu1 %1756, %v2217_v19  }
  0x55   : > { %300 = vperm.xlu0 %1765, %v2329_v38  }
  0x58   : > { %1757 = vset.pattern.permute.xlu1 %v3006_v13 }
  0x59   : > { %544 = vperm.xlu1 %1757, %v2273_v29   ;;  %305 = vperm.xlu0 %1765, %v2346_v41  }
  0x5d   : > { %1758 = vset.pattern.permute.xlu1 %v2045_v4  ;;  %1770 = vset.pattern.permute.xlu0 %v3006_v13 }
  0x5e   : > { %410 = vperm.xlu1 %1758, %v2238_v23   ;;  %568 = vperm.xlu0 %1770, %v2329_v38  }
  0x62   : > { %1759 = vset.pattern.permute.xlu1 %v3012_v3  ;;  %572 = vperm.xlu0 %1770, %v2346_v41  }
  0x63   : > { %285 = vperm.xlu1 %1759, %v2368_v44  }
  0x66   : > { %1774 = vset.pattern.permute.xlu0 %v2045_v4 }
  0x67   : > { %1760 = vset.pattern.permute.xlu1 %v2045_v4  ;;  %438 = vperm.xlu0 %1774, %v2385_v47  }
  0x68   : > { %414 = vperm.xlu1 %1760, %v2368_v44  }
  0x6c   : > { %1762 = vset.pattern.permute.xlu1 %v3012_v3 }
  0x6d   : > { %290 = vperm.xlu1 %1762, %v2290_v32  }
  0x71   : > { %1763 = vset.pattern.permute.xlu1 %v3006_v13 }
  0x72   : > { %556 = vperm.xlu1 %1763, %v2368_v44  }
  0x76   : > { %1764 = vset.pattern.permute.xlu1 %v3012_v3 }
  0x77   : > { %295 = vperm.xlu1 %1764, %v2306_v35  }
  0x7b   : > { %1766 = vset.pattern.permute.xlu1 %v3006_v13 }
  0x7c   : > { %560 = vperm.xlu1 %1766, %v2290_v32  }
  0x80   : > { %1767 = vset.pattern.permute.xlu1 %v2045_v4 }
  0x81   : > { %426 = vperm.xlu1 %1767, %v2329_v38  }
  0x85   : > { %1768 = vset.pattern.permute.xlu1 %v3006_v13  ;;  %v442_v13 = vpack.i.b16 %v375_v49, %v375_v49 }
  0x86   : > { %564 = vperm.xlu1 %1768, %v2306_v35   ;;  %v319_v35 = vpack.i.b16 %v236_v52, %v236_v52 }
  0x87   : > { %v2431_v45 = vrot.slane %v442_v13, %v228_v58 }
  0x88   : > { %v2437_v50 = vrot.slane %v319_v35, %v228_v58 }
  0x8a   : > { %1769 = vset.pattern.permute.xlu1 %v2045_v4 }
  0x8b   : > { %430 = vperm.xlu1 %1769, %v2346_v41   ;;  %v326_v41 = vpack.i.b16 %v237_v53, %v237_v53 }
  0x8f   : > { %1771 = vset.pattern.permute.xlu1 %v3012_v3  ;;  %v2433_v3 = vrot.slane %v449_v54, %v228_v58  ;;  %v3039_v54 = vmov 2  }
  0x90   : > { %310 = vperm.xlu1 %1771, %v2425_v60  }
  0x94   : > { %1772 = vset.pattern.permute.xlu1 %v2045_v4  ;;  %v2439_v4 = vrot.slane %v326_v41, %v228_v58 }
  0x95   : > { %434 = vperm.xlu1 %1772, %v2425_v60  }
  0x97   : > { %v246_v38 = vpop.permute.xlu1 %245 }
  0x98   : > { %v379_v55 = vpop.permute.xlu0 %378 }
  0x99   : > { %1773 = vset.pattern.permute.xlu1 %v3038_v46  ;;  %v455_v59 = vmul.bf16 %v2431_v45, %v379_v55  ;;  %v456_v61 = vmul.bf16 %v2433_v3, %v379_v55 }
  0x9a   : > { %315 = vperm.xlu1 %1773, %v2385_v47  }
  0x9c   : > { %v383_v62 = vpop.permute.xlu1 %382 }
  0x9d   : > { %v241_v63 = vpop.permute.xlu0 %240  ;;  %v457_v52 = vmul.bf16 %v2431_v45, %v383_v62  ;;  %v458_v55 = vmul.bf16 %v2433_v3, %v383_v62 }
  0x9e   : > { %v332_v53 = vmul.bf16 %v2437_v50, %v241_v63  ;;  %v333_v13 = vmul.bf16 %v2439_v4, %v241_v63  ;;  %1775 = vset.pattern.permute.xlu1 %v3039_v54 }
  0x9f   : > { %576 = vperm.xlu1 %1775, %v2425_v60  }
  0xa0   : > { %v487_v46 = vadd.bf16 %v455_v59, %v332_v53  ;;  %v488_v48 = vadd.bf16 %v456_v61, %v333_v13  ;;  %v334_v59 = vmul.bf16 %v2437_v50, %v246_v38  ;;  %v335_v61 = vmul.bf16 %v2439_v4, %v246_v38 }
  0xa1   : > { %v521_v35 = vpop.permute.xlu1 %520  ;;  %v251_v49 = vpop.permute.xlu0 %250 }
  0xa2   : > { %v583_v41 = vadd.bf16 %v521_v35, %v487_v46  ;;  %v584_v58 = vadd.bf16 %v521_v35, %v488_v48  ;;  %v337_v63 = vmul.bf16 %v2439_v4, %v251_v49  ;;  %v336_v53 = vmul.bf16 %v2437_v50, %v251_v49 }
  0xa3   : > { %580 = vperm.xlu1 %1775, %v2385_v47   ;;  %v489_v35 = vadd.bf16 %v457_v52, %v334_v59 }
  0xa4   : > { %1844 = vtanh.bf16 %v583_v41  ;;  %v490_v41 = vadd.bf16 %v458_v55, %v335_v61 }
  0xa5   : > { %1846 = vtanh.bf16 %v584_v58  ;;  %v256_v51 = vpop.permute.xlu0 %255 }
  0xa6   : > { %v387_v54 = vpop.permute.xlu1 %386  ;;  %v338_v44 = vmul.bf16 %v2437_v50, %v256_v51  ;;  %v339_v23 = vmul.bf16 %v2439_v4, %v256_v51 }
  0xa7   : > { %v460_v60 = vmul.bf16 %v2433_v3, %v387_v54  ;;  %v459_v13 = vmul.bf16 %v2431_v45, %v387_v54 }
  0xa9   : > { %v492_v48 = vadd.bf16 %v460_v60, %v337_v63  ;;  %v491_v57 = vadd.bf16 %v459_v13, %v336_v53 }
  0xaa   : > { %v529_v46 = vpop.permute.xlu0 %528 }
  0xab   : > { %v525_v58 = vpop.permute.xlu1 %524  ;;  %v588_v32 = vadd.bf16 %v529_v46, %v492_v48  ;;  %v587_v54 = vadd.bf16 %v529_v46, %v491_v57  ;;  %v1799_v57 = vld [vmem:[%s3003_s2 + $0x84] ss:$8 sps:$4 sm:$0xff]  }
  0xac   : > { %v585_v47 = vadd.bf16 %v525_v58, %v489_v35  ;;  %v586_v62 = vadd.bf16 %v525_v58, %v490_v41  ;;  %1111 = vmatprep.mubr.bf16.mxu1 %v1799_v57 }
  0xae   : > { %v533_v56 = vpop.permute.xlu0 %532  ;;  %1848 = vtanh.bf16 %v585_v47  ;;  %v1796_v47 = vld [vmem:[%s3003_s2 + $0x4] ss:$8 sps:$4 sm:$0xff]  }
  0xaf   : > { %v1845_v40 = vpop.eup %1844  ;;  %1850 = vtanh.bf16 %v586_v62  ;;  %1031 = vmatprep.mubr.bf16.mxu0 %v1796_v47 }
  0xb0   : > { %v1847_v38 = vpop.eup %1846  ;;  %v391_v49 = vpop.permute.xlu1 %390  ;;  %1852 = vtanh.bf16 %v588_v32 }
  0xb1   : > { %v461_v60 = vmul.bf16 %v2431_v45, %v391_v49  ;;  %v462_v52 = vmul.bf16 %v2433_v3, %v391_v49  ;;  %999 = vmatprep.subr.bf16.mxu0 %v1847_v38  ;;  %1663 = vmatprep.subr.bf16.mxu1 %v1847_v38  ;;  %1854 = vtanh.bf16 %v587_v54 }
  0xb2   : > { %1000 = vmatpush1.bf16.msra.mxu0 %v1845_v40  ;;  %1679 = vmatpush1.bf16.msra.mxu1 %v1845_v40  ;;  %v2460_v55 = vpop.permute.xlu0 %548 }
  0xb3   : > { %v493_v63 = vadd.bf16 %v461_v60, %v338_v44  ;;  %v494_v59 = vadd.bf16 %v462_v52, %v339_v23 }
  0xb5   : > { %v589_v51 = vadd.bf16 %v533_v56, %v493_v63  ;;  %v590_v61 = vadd.bf16 %v533_v56, %v494_v59  ;;  %v261_v53 = vpop.permute.xlu1 %260 }
  0xb6   : > { %v2468_v32 = vpop.permute.xlu0 %552  ;;  %v340_v62 = vmul.bf16 %v2437_v50, %v261_v53  ;;  %v341_v38 = vmul.bf16 %v2439_v4, %v261_v53 }
  0xb7   : > { %1856 = vtanh.bf16 %v589_v51  ;;  %v2047_v51 = vmov 3  }
  0xb8   : > { %1858 = vtanh.bf16 %v590_v61  ;;  %1776 = vset.pattern.permute.xlu1 %v2047_v51 }
  0xb9   : > { %v1849_v40 = vpop.eup %1848  ;;  %686 = vperm.xlu1 %1776, %v2144_v6  }
  0xba   : > { %v395_v23 = vpop.permute.xlu1 %394  ;;  %v1851_v44 = vpop.eup %1850 }
  0xbb   : > { %v399_v13 = vpop.permute.xlu0 %398  ;;  %1001 = vmatprep.subr.bf16.mxu0 %v1851_v44  ;;  %1664 = vmatprep.subr.bf16.mxu1 %v1851_v44  ;;  %v1853_v46 = vpop.eup %1852  ;;  %v463_v56 = vmul.bf16 %v2431_v45, %v395_v23  ;;  %v464_v48 = vmul.bf16 %v2433_v3, %v395_v23 }
  0xbc   : > { %1002 = vmatpush1.bf16.msra.mxu0 %v1849_v40  ;;  %1680 = vmatpush1.bf16.msra.mxu1 %v1849_v40  ;;  %v1855_v58 = vpop.eup %1854  ;;  %v465_v40 = vmul.bf16 %v2431_v45, %v399_v13  ;;  %v466_v23 = vmul.bf16 %v2433_v3, %v399_v13 }
  0xbd   : > { %1003 = vmatprep.subr.bf16.mxu0 %v1853_v46  ;;  %1665 = vmatprep.subr.bf16.mxu1 %v1853_v46  ;;  %v495_v60 = vadd.bf16 %v463_v56, %v340_v62  ;;  %v496_v52 = vadd.bf16 %v464_v48, %v341_v38 }
  0xbe   : > { %691 = vperm.xlu1 %1776, %v2123_v0  }
  0xbf   : > { %v266_v35 = vpop.permute.xlu1 %265  ;;  %v403_v41 = vpop.permute.xlu0 %402 }
  0xc0   : > { %1004 = vmatpush1.bf16.msra.mxu0 %v1855_v58  ;;  %1681 = vmatpush1.bf16.msra.mxu1 %v1855_v58  ;;  %v342_v61 = vmul.bf16 %v2437_v50, %v266_v35  ;;  %v343_v53 = vmul.bf16 %v2439_v4, %v266_v35  ;;  %v467_v35 = vmul.bf16 %v2431_v45, %v403_v41 }
  0xc1   : > { %v468_v13 = vmul.bf16 %v2433_v3, %v403_v41 }
  0xc2   : > { %v1857_v49 = vpop.eup %1856  ;;  %v497_v56 = vadd.bf16 %v465_v40, %v342_v61  ;;  %v498_v48 = vadd.bf16 %v466_v23, %v343_v53  ;;  %701 = vperm.xlu1 %1776, %v2155_v8  }
  0xc3   : > { %v1859_v54 = vpop.eup %1858  ;;  %v2474_v59 = vpop.permute.xlu0 %418 }
  0xc4   : > { %1005 = vmatprep.subr.bf16.mxu0 %v1859_v54  ;;  %1666 = vmatprep.subr.bf16.mxu1 %v1859_v54  ;;  %v537_v63 = vpop.permute.xlu1 %536 }
  0xc5   : > { %v591_v47 = vadd.bf16 %v537_v63, %v495_v60  ;;  %v592_v57 = vadd.bf16 %v537_v63, %v496_v52  ;;  %1006 = vmatpush1.bf16.msra.mxu0 %v1857_v49  ;;  %1682 = vmatpush1.bf16.msra.mxu1 %v1857_v49 }
  0xc6   : > { %711 = vperm.xlu1 %1776, %v2173_v11  }
  0xc7   : > { %1860 = vtanh.bf16 %v591_v47  ;;  %v2482_v46 = vpop.permute.xlu0 %422 }
  0xc8   : > { %1862 = vtanh.bf16 %v592_v57 }
  0xc9   : > { %v271_v44 = vpop.permute.xlu1 %270 }
  0xca   : > { %v344_v60 = vmul.bf16 %v2437_v50, %v271_v44  ;;  %v345_v0 = vmul.bf16 %v2439_v4, %v271_v44  ;;  %721 = vperm.xlu1 %1776, %v2208_v17  }
  0xcc   : > { %v276_v49 = vpop.permute.xlu0 %275  ;;  %v499_v61 = vadd.bf16 %v467_v35, %v344_v60  ;;  %v500_v53 = vadd.bf16 %v468_v13, %v345_v0  ;;  %v2048_v0 = vmov 4  }
  0xcd   : > { %v347_v63 = vmul.bf16 %v2439_v4, %v276_v49  ;;  %v346_v57 = vmul.bf16 %v2437_v50, %v276_v49  ;;  %1779 = vset.pattern.permute.xlu0 %v2048_v0 }
  0xce   : > { %v541_v58 = vpop.permute.xlu1 %540  ;;  %1777 = vset.pattern.permute.xlu1 %v2048_v0  ;;  %1261 = vperm.xlu0 %1779, %v2139_v5  }
  0xcf   : > { %v593_v62 = vadd.bf16 %v541_v58, %v497_v56  ;;  %v594_v38 = vadd.bf16 %v541_v58, %v498_v48  ;;  %1257 = vperm.xlu1 %1777, %v2148_v7  }
  0xd0   : > { %v281_v56 = vpop.permute.xlu0 %280 }
  0xd1   : > { %1864 = vtanh.bf16 %v593_v62  ;;  %v349_v49 = vmul.bf16 %v2439_v4, %v281_v56 }
  0xd2   : > { %v1861_v6 = vpop.eup %1860  ;;  %1866 = vtanh.bf16 %v594_v38  ;;  %v348_v38 = vmul.bf16 %v2437_v50, %v281_v56  ;;  %1265 = vperm.xlu0 %1779, %v2168_v10  }
  0xd3   : > { %v1863_v54 = vpop.eup %1862  ;;  %v407_v52 = vpop.permute.xlu1 %406  ;;  %1778 = vset.pattern.permute.xlu1 %v2047_v51 }
  0xd4   : > { %v470_v47 = vmul.bf16 %v2433_v3, %v407_v52  ;;  %1007 = vmatprep.subr.bf16.mxu0 %v1863_v54  ;;  %1667 = vmatprep.subr.bf16.mxu1 %v1863_v54  ;;  %v469_v8 = vmul.bf16 %v2431_v45, %v407_v52 }
  0xd5   : > { %1008 = vmatpush1.bf16.msra.mxu0 %v1861_v6  ;;  %1683 = vmatpush1.bf16.msra.mxu1 %v1861_v6 }
  0xd6   : > { %v502_v41 = vadd.bf16 %v470_v47, %v347_v63  ;;  %v501_v48 = vadd.bf16 %v469_v8, %v346_v57  ;;  %736 = vperm.xlu1 %1778, %v2249_v25   ;;  %1277 = vperm.xlu0 %1779, %v2255_v26  }
  0xd8   : > { %v545_v40 = vpop.permute.xlu1 %544  ;;  %v598_v58 = vadd.bf16 %v2460_v55, %v502_v41  ;;  %v597_v35 = vadd.bf16 %v2460_v55, %v501_v48 }
  0xd9   : > { %v595_v23 = vadd.bf16 %v545_v40, %v499_v61  ;;  %v596_v44 = vadd.bf16 %v545_v40, %v500_v53 }
  0xda   : > { %741 = vperm.xlu1 %1778, %v2260_v27   ;;  %1281 = vperm.xlu0 %1779, %v2273_v29   ;;  %v476_v29 = vmul.bf16 %v2433_v3, %v2474_v59 }
  0xdb   : > { %1868 = vtanh.bf16 %v595_v23 }
  0xdc   : > { %v1865_v62 = vpop.eup %1864  ;;  %1870 = vtanh.bf16 %v596_v44 }
  0xdd   : > { %v1867_v6 = vpop.eup %1866  ;;  %v411_v11 = vpop.permute.xlu1 %410  ;;  %1872 = vtanh.bf16 %v598_v58 }
  0xde   : > { %v471_v54 = vmul.bf16 %v2431_v45, %v411_v11  ;;  %v472_v13 = vmul.bf16 %v2433_v3, %v411_v11  ;;  %1009 = vmatprep.subr.bf16.mxu0 %v1867_v6  ;;  %1668 = vmatprep.subr.bf16.mxu1 %v1867_v6  ;;  %1874 = vtanh.bf16 %v597_v35 }
  0xdf   : > { %1010 = vmatpush1.bf16.msra.mxu0 %v1865_v62  ;;  %1684 = vmatpush1.bf16.msra.mxu1 %v1865_v62 }
  0xe0   : > { %v503_v17 = vadd.bf16 %v471_v54, %v348_v38  ;;  %v504_v60 = vadd.bf16 %v472_v13, %v349_v49  ;;  %746 = vperm.xlu1 %1778, %v2265_v28   ;;  %1784 = vset.pattern.permute.xlu0 %v2047_v51  ;;  %v475_v28 = vmul.bf16 %v2431_v45, %v2474_v59 }
  0xe1   : > { %681 = vperm.xlu0 %1784, %v2133_v2   ;;  %v301_v2 = vpop.permute.xlu0 %300 }
  0xe2   : > { %v599_v55 = vadd.bf16 %v2468_v32, %v503_v17  ;;  %v600_v52 = vadd.bf16 %v2468_v32, %v504_v60  ;;  %v286_v63 = vpop.permute.xlu1 %285  ;;  %v477_v60 = vmul.bf16 %v2431_v45, %v2482_v46 }
  0xe3   : > { %v350_v25 = vmul.bf16 %v2437_v50, %v286_v63  ;;  %v351_v61 = vmul.bf16 %v2439_v4, %v286_v63 }
  0xe4   : > { %1876 = vtanh.bf16 %v599_v55  ;;  %751 = vperm.xlu1 %1778, %v2197_v15  }
  0xe5   : > { %1878 = vtanh.bf16 %v600_v52  ;;  %696 = vperm.xlu0 %1784, %v2128_v1   ;;  %v306_v13 = vpop.permute.xlu0 %305 }
  0xe6   : > { %v1869_v47 = vpop.eup %1868 }
  0xe7   : > { %v415_v8 = vpop.permute.xlu1 %414  ;;  %v1871_v57 = vpop.eup %1870 }
  0xe8   : > { %1011 = vmatprep.subr.bf16.mxu0 %v1871_v57  ;;  %1669 = vmatprep.subr.bf16.mxu1 %v1871_v57  ;;  %v1873_v5 = vpop.eup %1872  ;;  %v473_v7 = vmul.bf16 %v2431_v45, %v415_v8  ;;  %v474_v32 = vmul.bf16 %v2433_v3, %v415_v8  ;;  %v356_v8 = vmul.bf16 %v2437_v50, %v301_v2 }
  0xe9   : > { %1012 = vmatpush1.bf16.msra.mxu0 %v1869_v47  ;;  %1685 = vmatpush1.bf16.msra.mxu1 %v1869_v47  ;;  %v1875_v10 = vpop.eup %1874  ;;  %v569_v57 = vpop.permute.xlu0 %568 }
  0xea   : > { %1013 = vmatprep.subr.bf16.mxu0 %v1873_v5  ;;  %1670 = vmatprep.subr.bf16.mxu1 %v1873_v5  ;;  %v505_v23 = vadd.bf16 %v473_v7, %v350_v25  ;;  %v506_v44 = vadd.bf16 %v474_v32, %v351_v61  ;;  %v358_v25 = vmul.bf16 %v2437_v50, %v306_v13 }
  0xeb   : > { %1780 = vset.pattern.permute.xlu1 %v2048_v0  ;;  %706 = vperm.xlu0 %1784, %v2160_v9   ;;  %v478_v9 = vmul.bf16 %v2433_v3, %v2482_v46 }
  0xec   : > { %v291_v41 = vpop.permute.xlu1 %290  ;;  %1269 = vperm.xlu1 %1780, %v2185_v14  }
  0xed   : > { %1014 = vmatpush1.bf16.msra.mxu0 %v1875_v10  ;;  %1686 = vmatpush1.bf16.msra.mxu1 %v1875_v10  ;;  %v352_v48 = vmul.bf16 %v2437_v50, %v291_v41  ;;  %v353_v58 = vmul.bf16 %v2439_v4, %v291_v41 }
  0xef   : > { %v1877_v53 = vpop.eup %1876  ;;  %v507_v15 = vadd.bf16 %v475_v28, %v352_v48  ;;  %v508_v38 = vadd.bf16 %v476_v29, %v353_v58  ;;  %716 = vperm.xlu0 %1784, %v2178_v12  }
  0xf0   : > { %v1879_v40 = vpop.eup %1878  ;;  %1781 = vset.pattern.permute.xlu1 %v2047_v51 }
  0xf1   : > { %1015 = vmatprep.subr.bf16.mxu0 %v1879_v40  ;;  %1671 = vmatprep.subr.bf16.mxu1 %v1879_v40  ;;  %v557_v27 = vpop.permute.xlu1 %556 }
  0xf2   : > { %v601_v56 = vadd.bf16 %v557_v27, %v505_v23  ;;  %v602_v26 = vadd.bf16 %v557_v27, %v506_v44  ;;  %1016 = vmatpush1.bf16.msra.mxu0 %v1877_v53  ;;  %1687 = vmatpush1.bf16.msra.mxu1 %v1877_v53 }
  0xf3   : > { %761 = vperm.xlu1 %1781, %v2223_v20   ;;  %v357_v20 = vmul.bf16 %v2439_v4, %v301_v2  ;;  %726 = vperm.xlu0 %1784, %v2213_v18   ;;  %v573_v18 = vpop.permute.xlu0 %572 }
  0xf4   : > { %1880 = vtanh.bf16 %v601_v56 }
  0xf5   : > { %1882 = vtanh.bf16 %v602_v26 }
  0xf6   : > { %v296_v62 = vpop.permute.xlu1 %295 }
  0xf7   : > { %v354_v14 = vmul.bf16 %v2437_v50, %v296_v62  ;;  %v355_v1 = vmul.bf16 %v2439_v4, %v296_v62  ;;  %1782 = vset.pattern.permute.xlu1 %v2048_v0  ;;  %731 = vperm.xlu0 %1784, %v2244_v24   ;;  %v439_v58 = vpop.permute.xlu0 %438 }
  0xf8   : > { %1273 = vperm.xlu1 %1782, %v2233_v22   ;;  %v359_v22 = vmul.bf16 %v2439_v4, %v306_v13  ;;  %v486_v2 = vmul.bf16 %v2433_v3, %v439_v58 }
  0xf9   : > { %v509_v63 = vadd.bf16 %v477_v60, %v354_v14  ;;  %v510_v47 = vadd.bf16 %v478_v9, %v355_v1  ;;  %v3040_v1 = vld [vmem:[#allocation5_spill] sm:$0xff]  ;;  %v3043_v60 = vld [vmem:[#allocation16_spill] sm:$0xff] }
  0xfb   : > { %v561_v49 = vpop.permute.xlu1 %560  ;;  %756 = vperm.xlu0 %1784, %v2202_v16  }
  0xfc   : > { %v603_v6 = vadd.bf16 %v561_v49, %v507_v15  ;;  %v604_v11 = vadd.bf16 %v561_v49, %v508_v38  ;;  %1783 = vset.pattern.permute.xlu1 %v2047_v51  ;;  %v485_v38 = vmul.bf16 %v2431_v45, %v439_v58  ;;  %v1838_v58 = vld [vmem:[%s3003_s2 + $0xe0] ss:$8 sps:$4 sm:$0xff]  }
  0xfd   : > { %776 = vperm.xlu1 %1783, %v2359_v43  }
  0xfe   : > { %1884 = vtanh.bf16 %v603_v6 }
  0xff   : > { %v1881_v59 = vpop.eup %1880  ;;  %1886 = vtanh.bf16 %v604_v11  ;;  %766 = vperm.xlu0 %1784, %v2228_v21  }
 0x100   : > { %v1883_v35 = vpop.eup %1882  ;;  %v427_v54 = vpop.permute.xlu1 %426 }
 0x101   : > { %v480_v17 = vmul.bf16 %v2433_v3, %v427_v54  ;;  %1017 = vmatprep.subr.bf16.mxu0 %v1883_v35  ;;  %1672 = vmatprep.subr.bf16.mxu1 %v1883_v35  ;;  %v479_v55 = vmul.bf16 %v2431_v45, %v427_v54  ;;  %v3041_v54 = vld [vmem:[#allocation11_spill] sm:$0xff] }
 0x102   : > { %1018 = vmatpush1.bf16.msra.mxu0 %v1881_v59  ;;  %1688 = vmatpush1.bf16.msra.mxu1 %v1881_v59 }
 0x103   : > { %v512_v52 = vadd.bf16 %v480_v17, %v357_v20  ;;  %v511_v32 = vadd.bf16 %v479_v55, %v356_v8  ;;  %781 = vperm.xlu1 %1783, %v2278_v30   ;;  %771 = vperm.xlu0 %1784, %v2354_v42   ;;  %v1794_v20 = vld [vmem:[%s3003_s2] ss:$8 sps:$4 sm:$0xff]  }
 0x104   : > { %v1797_v55 = vld [vmem:[%s3003_s2 + $0x80] ss:$8 sps:$4 sm:$0xff]  }
 0x105   : > { %v565_v5 = vpop.permute.xlu1 %564  ;;  %v608_v41 = vadd.bf16 %v569_v57, %v512_v52  ;;  %v607_v53 = vadd.bf16 %v569_v57, %v511_v32  ;;  %v1800_v52 = vld [vmem:[%s3003_s2 + $0x14] ss:$8 sps:$4 sm:$0xff]   ;;  %v3046_v8 = vld [vmem:[#allocation13_spill] sm:$0xff] }
 0x106   : > { %v605_v46 = vadd.bf16 %v565_v5, %v509_v63  ;;  %v606_v7 = vadd.bf16 %v565_v5, %v510_v47  ;;  %v1802_v63 = vld [vmem:[%s3003_s2 + $0x94] ss:$8 sps:$4 sm:$0xff]   ;;  %v3045_v47 = vld [vmem:[#allocation17_spill] sm:$0xff]  ;;  %v1804_v5 = vld [vmem:[%s3003_s2 + $0x10] ss:$8 sps:$4 sm:$0xff]  }
 0x107   : > { %786 = vperm.xlu1 %1783, %v2283_v31   ;;  %796 = vperm.xlu0 %1784, %v2300_v34   ;;  %v3047_v57 = vld [vmem:[#allocation12_spill] sm:$0xff]  ;;  %v1808_v32 = vld [vmem:[%s3003_s2 + $0xa4] ss:$8 sps:$4 sm:$0xff]  }
 0x108   : > { %1888 = vtanh.bf16 %v605_v46  ;;  %v1805_v46 = vld [vmem:[%s3003_s2 + $0x90] ss:$8 sps:$4 sm:$0xff]  }
 0x109   : > { %v1885_v10 = vpop.eup %1884  ;;  %1890 = vtanh.bf16 %v606_v7  ;;  %v3048_v7 = vld [vmem:[#allocation10_spill] sm:$0xff] }
 0x10a   : > { %v1887_v12 = vpop.eup %1886  ;;  %v431_v61 = vpop.permute.xlu1 %430  ;;  %1892 = vtanh.bf16 %v608_v41  ;;  %v3049_v41 = vld [vmem:[#allocation7_spill] sm:$0xff] }
 0x10b   : > { %v481_v40 = vmul.bf16 %v2431_v45, %v431_v61  ;;  %v482_v23 = vmul.bf16 %v2433_v3, %v431_v61  ;;  %1019 = vmatprep.subr.bf16.mxu0 %v1887_v12  ;;  %1673 = vmatprep.subr.bf16.mxu1 %v1887_v12  ;;  %1894 = vtanh.bf16 %v607_v53  ;;  %v2049_v12 = vmov 5   ;;  %v1812_v61 = vld [vmem:[%s3003_s2 + $0x34] ss:$8 sps:$4 sm:$0xff]  }
 0x10c   : > { %1020 = vmatpush1.bf16.msra.mxu0 %v1885_v10  ;;  %1689 = vmatpush1.bf16.msra.mxu1 %v1885_v10  ;;  %v224_v10 = vld [vmem:[%s3002_s1] sm:$0x1]  ;;  %v1814_v53 = vld [vmem:[%s3003_s2 + $0xb4] ss:$8 sps:$4 sm:$0xff]  }
 0x10d   : > { %v513_v44 = vadd.bf16 %v481_v40, %v358_v25  ;;  %v514_v43 = vadd.bf16 %v482_v23, %v359_v22  ;;  %791 = vperm.xlu1 %1783, %v2295_v33   ;;  %806 = vperm.xlu0 %1784, %v2323_v37   ;;  %v3050_v25 = vld [vmem:[#allocation8_spill] sm:$0xff]  ;;  %v3051_v40 = vld [vmem:[#allocation18_spill] sm:$0xff] }
 0x10e   : > { %v1810_v22 = vld [vmem:[%s3003_s2 + $0x20] ss:$8 sps:$4 sm:$0xff]   ;;  %v3052_v23 = vld [vmem:[#allocation14_spill] sm:$0xff] }
 0x10f   : > { %v609_v27 = vadd.bf16 %v573_v18, %v513_v44  ;;  %v610_v56 = vadd.bf16 %v573_v18, %v514_v43  ;;  %v311_v26 = vpop.permute.xlu1 %310  ;;  %v1816_v18 = vld [vmem:[%s3003_s2 + $0x30] ss:$8 sps:$4 sm:$0xff]   ;;  %v1818_v43 = vld [vmem:[%s3003_s2 + $0x44] ss:$8 sps:$4 sm:$0xff]  }
 0x110   : > { %v360_v21 = vmul.bf16 %v2437_v50, %v311_v26  ;;  %v361_v62 = vmul.bf16 %v2439_v4, %v311_v26  ;;  %v1817_v44 = vld [vmem:[%s3003_s2 + $0xb0] ss:$8 sps:$4 sm:$0xff]   ;;  %v1823_v26 = vld [vmem:[%s3003_s2 + $0xc0] ss:$8 sps:$4 sm:$0xff]  }
 0x111   : > { %1896 = vtanh.bf16 %v609_v27  ;;  %1785 = vset.pattern.permute.xlu1 %v2048_v0  ;;  %811 = vperm.xlu0 %1784, %v2334_v39   ;;  %v3044_v39 = vld [vmem:[#allocation6_spill] sm:$0xff] }
 0x112   : > { %1898 = vtanh.bf16 %v610_v56  ;;  %1285 = vperm.xlu1 %1785, %v2217_v19   ;;  %v1820_v27 = vld [vmem:[%s3003_s2 + $0xc4] ss:$8 sps:$4 sm:$0xff]   ;;  %v1822_v56 = vld [vmem:[%s3003_s2 + $0x40] ss:$8 sps:$4 sm:$0xff]  }
 0x113   : > { %v1889_v28 = vpop.eup %1888 }
 0x114   : > { %v435_v29 = vpop.permute.xlu1 %434  ;;  %v1891_v48 = vpop.eup %1890 }
 0x115   : > { %1021 = vmatprep.subr.bf16.mxu0 %v1891_v48  ;;  %1674 = vmatprep.subr.bf16.mxu1 %v1891_v48  ;;  %v1893_v24 = vpop.eup %1892  ;;  %v483_v30 = vmul.bf16 %v2431_v45, %v435_v29  ;;  %v484_v31 = vmul.bf16 %v2433_v3, %v435_v29  ;;  %v1826_v29 = vld [vmem:[%s3003_s2 + $0xd4] ss:$8 sps:$4 sm:$0xff]   ;;  %v1828_v48 = vld [vmem:[%s3003_s2 + $0x50] ss:$8 sps:$4 sm:$0xff]  }
 0x116   : > { %1022 = vmatpush1.bf16.msra.mxu0 %v1889_v28  ;;  %1690 = vmatpush1.bf16.msra.mxu1 %v1889_v28  ;;  %v1895_v33 = vpop.eup %1894  ;;  %v1824_v28 = vld [vmem:[%s3003_s2 + $0x54] ss:$8 sps:$4 sm:$0xff]  }
 0x117   : > { %1023 = vmatprep.subr.bf16.mxu0 %v1893_v24  ;;  %1675 = vmatprep.subr.bf16.mxu1 %v1893_v24  ;;  %v515_v42 = vadd.bf16 %v483_v30, %v360_v21  ;;  %v516_v59 = vadd.bf16 %v484_v31, %v361_v62  ;;  %v1829_v24 = vld [vmem:[%s3003_s2 + $0xd0] ss:$8 sps:$4 sm:$0xff]   ;;  %v1830_v30 = vld [vmem:[%s3003_s2 + $0x64] ss:$8 sps:$4 sm:$0xff]   ;;  %v1839_v21 = vld [vmem:[%s3003_s2 + $0xf4] ss:$8 sps:$4 sm:$0xff]  }
 0x118   : > { %1786 = vset.pattern.permute.xlu1 %v2047_v51  ;;  %1789 = vset.pattern.permute.xlu0 %v2048_v0  ;;  %v1836_v31 = vld [vmem:[%s3003_s2 + $0xe4] ss:$8 sps:$4 sm:$0xff]   ;;  %v1835_v62 = vld [vmem:[%s3003_s2 + $0x70] ss:$8 sps:$4 sm:$0xff]  }
 0x119   : > { %v316_v16 = vpop.permute.xlu1 %315  ;;  %801 = vperm.xlu1 %1786, %v2318_v36   ;;  %1293 = vperm.xlu0 %1789, %v3041_v54   ;;  %v3042_v36 = vld [vmem:[#allocation9_spill] sm:$0xff] }
 0x11a   : > { %1024 = vmatpush1.bf16.msra.mxu0 %v1895_v33  ;;  %1691 = vmatpush1.bf16.msra.mxu1 %v1895_v33  ;;  %v362_v6 = vmul.bf16 %v2437_v50, %v316_v16  ;;  %v363_v11 = vmul.bf16 %v2439_v4, %v316_v16  ;;  %v1832_v16 = vld [vmem:[%s3003_s2 + $0x60] ss:$8 sps:$4 sm:$0xff]   ;;  %v1833_v33 = vld [vmem:[%s3003_s2 + $0x74] ss:$8 sps:$4 sm:$0xff]  }
 0x11c   : > { %v1897_v15 = vpop.eup %1896  ;;  %v517_v3 = vadd.bf16 %v485_v38, %v362_v6  ;;  %v518_v45 = vadd.bf16 %v486_v2, %v363_v11 }
 0x11d   : > { %v1899_v49 = vpop.eup %1898  ;;  %1787 = vset.pattern.permute.xlu1 %v2048_v0  ;;  %1297 = vperm.xlu0 %1789, %v3044_v39  }
 0x11e   : > { %1025 = vmatprep.subr.bf16.mxu0 %v1899_v49  ;;  %1676 = vmatprep.subr.bf16.mxu1 %v1899_v49  ;;  %v577_v19 = vpop.permute.xlu1 %576 }
 0x11f   : > { %v611_v35 = vadd.bf16 %v577_v19, %v515_v42  ;;  %v612_v14 = vadd.bf16 %v577_v19, %v516_v59  ;;  %1026 = vmatpush1.bf16.msra.mxu0 %v1897_v15  ;;  %1692 = vmatpush1.bf16.msra.mxu1 %v1897_v15  ;;  %v1841_v15 = vld [vmem:[%s3003_s2 + $0xf0] ss:$8 sps:$4 sm:$0xff]  }
 0x120   : > { %1289 = vperm.xlu1 %1787, %v3040_v1  }
 0x121   : > { %1900 = vtanh.bf16 %v611_v35  ;;  %1790 = vset.pattern.permute.xlu0 %v2047_v51 }
 0x122   : > { %1902 = vtanh.bf16 %v612_v14  ;;  %v581_v50 = vpop.permute.xlu1 %580  ;;  %836 = vperm.xlu0 %1790, %v3046_v8  }
 0x123   : > { %v613_v4 = vadd.bf16 %v581_v50, %v517_v3  ;;  %v614_v34 = vadd.bf16 %v581_v50, %v518_v45 }
 0x124   : > { %1788 = vset.pattern.permute.xlu1 %v2047_v51  ;;  %v1806_v51 = vld [vmem:[%s3003_s2 + $0x24] ss:$8 sps:$4 sm:$0xff]  }
 0x125   : > { %1904 = vtanh.bf16 %v613_v4  ;;  %816 = vperm.xlu1 %1788, %v3042_v36  }
 0x126   : > { %1906 = vtanh.bf16 %v614_v34  ;;  %1792 = vset.pattern.permute.xlu0 %v2048_v0 }
 0x127   : > { %1309 = vperm.xlu0 %1792, %v3048_v7  }
 0x129   : > { %821 = vperm.xlu1 %1788, %v3043_v60  }
 0x12b   : > { %1793 = vset.pattern.permute.xlu0 %v2049_v12 }
 0x12c   : > { %v1901_v37 = vpop.eup %1900  ;;  %1492 = vperm.xlu0 %1793, %v224_v10  }
 0x12d   : > { %v1903_v13 = vpop.eup %1902  ;;  %826 = vperm.xlu1 %1788, %v3045_v47  }
 0x12e   : > { %1027 = vmatprep.subr.bf16.mxu0 %v1903_v13  ;;  %1677 = vmatprep.subr.bf16.mxu1 %v1903_v13 }
 0x12f   : > { %1028 = vmatpush1.bf16.msra.mxu0 %v1901_v37  ;;  %1693 = vmatpush1.bf16.msra.mxu1 %v1901_v37 }
 0x130   : > { %v1905_v17 = vpop.eup %1904 }
 0x131   : > { %v1907_v9 = vpop.eup %1906  ;;  %831 = vperm.xlu1 %1788, %v3047_v57  }
 0x132   : > { %1029 = vmatprep.subr.bf16.mxu0 %v1907_v9  ;;  %1678 = vmatprep.subr.bf16.mxu1 %v1907_v9 }
 0x133   : > { %1030 = vmatpush1.bf16.msra.mxu0 %v1905_v17  ;;  %1694 = vmatpush1.bf16.msra.mxu1 %v1905_v17 }
 0x135   : > { %1791 = vset.pattern.permute.xlu1 %v2048_v0  ;;  %v1811_v0 = vld [vmem:[%s3003_s2 + $0xa0] ss:$8 sps:$4 sm:$0xff]  }
 0x136   : > { %1032 = vmatmul.mubr.bf16.vlgmr.msra.gmra.mrb[0].mxu0 %v1794_v20  ;;  %1112 = vmatmul.mubr.bf16.vlgmr.msra.gmra.mrb[0].mxu1 %v1797_v55 }
 0x137   : > { %1041 = vmatprep.mubr.bf16.mxu0 %v1800_v52  ;;  %1121 = vmatprep.mubr.bf16.mxu1 %v1802_v63 }
 0x138   : > { %1301 = vperm.xlu1 %1791, %v3049_v41   ;;  %v687_v38 = vpop.permute.xlu1 %686 }
 0x13c   : > { %1305 = vperm.xlu1 %1791, %v3050_v25  }
 0x13d   : > { %v2688_v2 = vpop.permute.xlu1 %691 }
 0x13e   : > { %1042 = vmatmul.mubr.bf16.gmra.mrb[4].mxu0 %v1804_v5  ;;  %1122 = vmatmul.mubr.bf16.gmra.mrb[4].mxu1 %v1805_v46 }
 0x13f   : > { %1051 = vmatprep.mubr.bf16.mxu0 %v1806_v51  ;;  %1131 = vmatprep.mubr.bf16.mxu1 %v1808_v32 }
 0x140   : > { %1313 = vperm.xlu1 %1791, %v3051_v40  }
 0x141   : > { %v2690_v49 = vpop.permute.xlu1 %701 }
 0x144   : > { %1317 = vperm.xlu1 %1791, %v3052_v23  }
 0x145   : > { %v2692_v6 = vpop.permute.xlu1 %711 }
 0x146   : > { %1052 = vmatmul.mubr.bf16.gmra.mrb[8].mxu0 %v1810_v22  ;;  %1132 = vmatmul.mubr.bf16.gmra.mrb[8].mxu1 %v1811_v0 }
 0x147   : > { %1061 = vmatprep.mubr.bf16.mxu0 %v1812_v61  ;;  %1141 = vmatprep.mubr.bf16.mxu1 %v1814_v53 }
 0x149   : > { %v2694_v11 = vpop.permute.xlu1 %721 }
 0x14d   : > { %v2698_v59 = vpop.permute.xlu0 %1261 }
 0x14e   : > { %1062 = vmatmul.mubr.bf16.gmra.mrb[12].mxu0 %v1816_v18  ;;  %1142 = vmatmul.mubr.bf16.gmra.mrb[12].mxu1 %v1817_v44  ;;  %v2696_v42 = vpop.permute.xlu1 %1257 }
 0x14f   : > { %1071 = vmatprep.mubr.bf16.mxu0 %v1818_v43  ;;  %1151 = vmatprep.mubr.bf16.mxu1 %v1820_v27 }
 0x151   : > { %v2702_v35 = vpop.permute.xlu0 %1265 }
 0x155   : > { %v2700_v19 = vpop.permute.xlu1 %736  ;;  %v2706_v3 = vpop.permute.xlu0 %1277 }
 0x156   : > { %1072 = vmatmul.mubr.bf16.gmra.mrb[16].mxu0 %v1822_v56  ;;  %1152 = vmatmul.mubr.bf16.gmra.mrb[16].mxu1 %v1823_v26 }
 0x157   : > { %1081 = vmatprep.mubr.bf16.mxu0 %v1824_v28  ;;  %1161 = vmatprep.mubr.bf16.mxu1 %v1826_v29 }
 0x159   : > { %v2704_v14 = vpop.permute.xlu1 %741  ;;  %v2710_v50 = vpop.permute.xlu0 %1281 }
 0x15e   : > { %1082 = vmatmul.mubr.bf16.gmra.mrb[20].mxu0 %v1828_v48  ;;  %1162 = vmatmul.mubr.bf16.gmra.mrb[20].mxu1 %v1829_v24 }
 0x15f   : > { %1091 = vmatprep.mubr.bf16.mxu0 %v1830_v30  ;;  %1171 = vmatprep.mubr.bf16.mxu1 %v1836_v31  ;;  %v2708_v45 = vpop.permute.xlu1 %746 }
 0x160   : > { %v682_v34 = vpop.permute.xlu0 %681 }
 0x163   : > { %v2712_v4 = vpop.permute.xlu1 %751 }
 0x164   : > { %v697_v54 = vpop.permute.xlu0 %696 }
 0x166   : > { %1092 = vmatmul.mubr.bf16.gmra.mrb[24].mxu0 %v1832_v16  ;;  %1172 = vmatmul.mubr.bf16.gmra.mrb[24].mxu1 %v1838_v58 }
 0x167   : > { %1101 = vmatprep.mubr.bf16.mxu0 %v1833_v33  ;;  %1181 = vmatprep.mubr.bf16.mxu1 %v1839_v21 }
 0x16a   : > { %v2716_v37 = vpop.permute.xlu0 %706 }
 0x16b   : > { %v2714_v1 = vpop.permute.xlu1 %1269 }
 0x16e   : > { %1102 = vmatmul.mubr.bf16.gmra.mrb[28].mxu0 %v1835_v62  ;;  %1182 = vmatmul.mubr.bf16.gmra.mrb[28].mxu1 %v1841_v15  ;;  %v2720_v17 = vpop.permute.xlu0 %716 }
 0x172   : > { %v762_v36 = vpop.permute.xlu1 %761  ;;  %v2722_v39 = vpop.permute.xlu0 %726 }
 0x176   : > { %v2726_v20 = vpop.permute.xlu0 %731 }
 0x177   : > { %v2718_v13 = vpop.permute.xlu1 %1273 }
 0x17a   : > { %v2730_v52 = vpop.permute.xlu0 %756 }
 0x17c   : > { %v777_v60 = vpop.permute.xlu1 %776 }
 0x17e   : > { %v767_v47 = vpop.permute.xlu0 %766 }
 0x182   : > { %v2724_v9 = vpop.permute.xlu1 %781  ;;  %v772_v56 = vpop.permute.xlu0 %771 }
 0x186   : > { %v2728_v55 = vpop.permute.xlu1 %786 }
 0x18c   : > { %v2732_v63 = vpop.permute.xlu1 %791 }
 0x191   : > { %v2746_v27 = vpop.permute.xlu1 %1285 }
 0x209   : > { %v1033_v8 = vpop.f32.mrb[0].mxu0  ;;  %v1113_v57 = vpop.f32.mrb[0].mxu1 }
 0x20a   : > { %v1035_v5 = vpop.f32.mrb[1].mxu0  ;;  %v2734_v46 = vadd.f32 %v1113_v57, %v762_v36  ;;  %v1115_v7 = vpop.f32.mrb[1].mxu1  ;;  %v1034_v10 = vadd.f32 %v1033_v8, %v682_v34 }
 0x20b   : > { %v1037_v51 = vpop.f32.mrb[2].mxu0  ;;  %v2736_v32 = vadd.f32 %v1115_v7, %v762_v36  ;;  %v1117_v41 = vpop.f32.mrb[2].mxu1  ;;  %v1036_v61 = vadd.f32 %v1035_v5, %v682_v34 }
 0x20c   : > { %v1038_v12 = vadd.f32 %v1037_v51, %v687_v38  ;;  %v1039_v25 = vpop.f32.mrb[3].mxu0  ;;  %v2738_v22 = vadd.f32 %v1117_v41, %v767_v47  ;;  %v1119_v0 = vpop.f32.mrb[3].mxu1 }
 0x20d   : > { %v1040_v53 = vadd.f32 %v1039_v25, %v687_v38  ;;  %v2740_v40 = vadd.f32 %v1119_v0, %v767_v47  ;;  %v2762_v7 = vpop.permute.xlu1 %801  ;;  %v797_v51 = vpop.permute.xlu0 %796 }
 0x20e   : > { %v1192_v23 = vpack.c.bf16 %v1038_v12, %v1034_v10  ;;  %v1208_v18 = vpack.c.bf16 %v2738_v22, %v2734_v46 }
 0x20f   : > { %v1193_v44 = vpack.c.bf16 %v1040_v53, %v1036_v61  ;;  %v1209_v43 = vpack.c.bf16 %v2740_v40, %v2736_v32 }
 0x210   : > { %1908 = vtanh.bf16 %v1192_v23 }
 0x211   : > { %1910 = vtanh.bf16 %v1193_v44  ;;  %v1043_v26 = vpop.f32.mrb[4].mxu0  ;;  %v1123_v28 = vpop.f32.mrb[4].mxu1 }
 0x212   : > { %v1045_v29 = vpop.f32.mrb[5].mxu0  ;;  %v2748_v48 = vadd.f32 %v1123_v28, %v772_v56  ;;  %v1125_v24 = vpop.f32.mrb[5].mxu1  ;;  %v1044_v58 = vadd.f32 %v1043_v26, %v2688_v2 }
 0x213   : > { %v1047_v30 = vpop.f32.mrb[6].mxu0  ;;  %v2750_v31 = vadd.f32 %v1125_v24, %v772_v56  ;;  %v1127_v16 = vpop.f32.mrb[6].mxu1  ;;  %v1046_v38 = vadd.f32 %v1045_v29, %v2688_v2 }
 0x214   : > { %v1048_v33 = vadd.f32 %v1047_v30, %v697_v54  ;;  %v1049_v21 = vpop.f32.mrb[7].mxu0  ;;  %v2753_v62 = vadd.f32 %v1127_v16, %v777_v60  ;;  %v1129_v15 = vpop.f32.mrb[7].mxu1 }
 0x215   : > { %v1050_v34 = vadd.f32 %v1049_v21, %v697_v54  ;;  %v2756_v36 = vadd.f32 %v1129_v15, %v777_v60 }
 0x216   : > { %v1194_v47 = vpack.c.bf16 %v1048_v33, %v1044_v58  ;;  %v3053_v32 = vpack.c.bf16 %v2753_v62, %v2748_v48 }
 0x217   : > { %v1195_v57 = vpack.c.bf16 %v1050_v34, %v1046_v38 }
 0x218   : > { %1912 = vtanh.bf16 %v1194_v47 }
 0x219   : > { %1914 = vtanh.bf16 %v1195_v57  ;;  %v1053_v41 = vpop.f32.mrb[8].mxu0  ;;  %v1133_v10 = vpop.f32.mrb[8].mxu1 }
 0x21a   : > { %v1055_v12 = vpop.f32.mrb[9].mxu0  ;;  %v1135_v2 = vpop.f32.mrb[9].mxu1  ;;  %v1054_v61 = vadd.f32 %v1053_v41, %v2690_v49  ;;  %v2770_v29 = vadd.f32 %v1133_v10, %v2724_v9 }
 0x21b   : > { %v1909_v54 = vpop.eup %1908  ;;  %v1057_v60 = vpop.f32.mrb[10].mxu0  ;;  %v1056_v26 = vadd.f32 %v1055_v12, %v2690_v49  ;;  %v2773_v30 = vadd.f32 %v1135_v2, %v2724_v9 }
 0x21c   : > { %v1137_v25 = vpop.f32.mrb[10].mxu1  ;;  %v1911_v0 = vpop.eup %1910  ;;  %v1058_v53 = vadd.f32 %v1057_v60, %v2716_v37  ;;  %v1320_v56 = vmul.bf16 %v1909_v54, %v2696_v42 }
 0x21d   : > { %v1059_v23 = vpop.f32.mrb[11].mxu0  ;;  %v1139_v44 = vpop.f32.mrb[11].mxu1  ;;  %v2776_v16 = vadd.f32 %v1137_v25, %v2728_v55  ;;  %v1321_v33 = vmul.bf16 %v1911_v0, %v2696_v42 }
 0x21e   : > { %v1060_v28 = vadd.f32 %v1059_v23, %v2716_v37  ;;  %v1196_v24 = vpack.c.bf16 %v1058_v53, %v1054_v61  ;;  %v2779_v58 = vadd.f32 %v1139_v44, %v2728_v55  ;;  %v2782_v49 = vpop.permute.xlu1 %1289  ;;  %v2784_v37 = vpop.permute.xlu0 %806  ;;  %v1352_v15 = vunpack.c.l.bf16 %v1320_v56 }
 0x21f   : > { %v1354_v9 = vunpack.c.h.bf16 %v1320_v56  ;;  %v1353_v12 = vunpack.c.l.bf16 %v1321_v33  ;;  %v1355_v2 = vunpack.c.h.bf16 %v1321_v33 }
 0x220   : > { %v1197_v21 = vpack.c.bf16 %v1060_v28, %v1056_v26  ;;  %1916 = vtanh.bf16 %v1196_v24 }
 0x221   : > { %v1063_v38 = vpop.f32.mrb[12].mxu0  ;;  %v1143_v34 = vpop.f32.mrb[12].mxu1 }
 0x222   : > { %1918 = vtanh.bf16 %v1197_v21  ;;  %v1065_v47 = vpop.f32.mrb[13].mxu0  ;;  %v2791_v42 = vadd.f32 %v1143_v34, %v2732_v63  ;;  %v1145_v41 = vpop.f32.mrb[13].mxu1  ;;  %v1064_v53 = vadd.f32 %v1063_v38, %v2692_v6  ;;  %v1416_v21 = vadd.f32 %v1354_v9, %v1352_v15 }
 0x223   : > { %v1913_v10 = vpop.eup %1912  ;;  %v1067_v54 = vpop.f32.mrb[14].mxu0  ;;  %v2794_v60 = vadd.f32 %v1145_v41, %v2732_v63  ;;  %v1066_v24 = vadd.f32 %v1065_v47, %v2692_v6 }
 0x224   : > { %v1147_v25 = vpop.f32.mrb[14].mxu1  ;;  %v1915_v0 = vpop.eup %1914  ;;  %v1322_v61 = vmul.bf16 %v1913_v10, %v2698_v59  ;;  %v1068_v23 = vadd.f32 %v1067_v54, %v2720_v17  ;;  %v1453_v10 = vadd.f32 %v1355_v2, %v1353_v12 }
 0x225   : > { %v1069_v44 = vpop.f32.mrb[15].mxu0  ;;  %v2799_v56 = vadd.f32 %v1147_v25, %v797_v51  ;;  %v1149_v26 = vpop.f32.mrb[15].mxu1  ;;  %v1323_v28 = vmul.bf16 %v1915_v0, %v2698_v59 }
 0x226   : > { %v1070_v33 = vadd.f32 %v1069_v44, %v2720_v17  ;;  %v2804_v63 = vadd.f32 %v1149_v26, %v797_v51  ;;  %v1356_v34 = vunpack.c.l.bf16 %v1322_v61  ;;  %v1198_v41 = vpack.c.bf16 %v1068_v23, %v1064_v53  ;;  %v817_v6 = vpop.permute.xlu1 %816  ;;  %v812_v47 = vpop.permute.xlu0 %811 }
 0x227   : > { %v1357_v54 = vunpack.c.l.bf16 %v1323_v28  ;;  %v1358_v57 = vunpack.c.h.bf16 %v1322_v61  ;;  %v1359_v17 = vunpack.c.h.bf16 %v1323_v28 }
 0x228   : > { %v1199_v55 = vpack.c.bf16 %v1070_v33, %v1066_v24  ;;  %v1417_v59 = vadd.f32 %v1416_v21, %v1356_v34  ;;  %1920 = vtanh.bf16 %v1198_v41 }
 0x229   : > { %v1454_v51 = vadd.f32 %v1453_v10, %v1357_v54  ;;  %v1073_v15 = vpop.f32.mrb[16].mxu0  ;;  %v1153_v9 = vpop.f32.mrb[16].mxu1 }
 0x22a   : > { %1922 = vtanh.bf16 %v1199_v55  ;;  %v1418_v0 = vadd.f32 %v1417_v59, %v1358_v57  ;;  %v2811_v53 = vadd.f32 %v1153_v9, %v2762_v7  ;;  %v1075_v12 = vpop.f32.mrb[17].mxu0  ;;  %v1155_v2 = vpop.f32.mrb[17].mxu1  ;;  %v1074_v55 = vadd.f32 %v1073_v15, %v2694_v11 }
 0x22b   : > { %v1917_v23 = vpop.eup %1916  ;;  %v1455_v44 = vadd.f32 %v1454_v51, %v1359_v17  ;;  %v2814_v26 = vadd.f32 %v1155_v2, %v2762_v7  ;;  %v1077_v61 = vpop.f32.mrb[18].mxu0  ;;  %v1076_v54 = vadd.f32 %v1075_v12, %v2694_v11 }
 0x22c   : > { %v1157_v24 = vpop.f32.mrb[18].mxu1  ;;  %v1324_v28 = vmul.bf16 %v1917_v23, %v2702_v35  ;;  %v1078_v21 = vadd.f32 %v1077_v61, %v2722_v39  ;;  %v1079_v34 = vpop.f32.mrb[19].mxu0 }
 0x22d   : > { %v1919_v33 = vpop.eup %1918  ;;  %v2820_v57 = vadd.f32 %v1157_v24, %v2784_v37  ;;  %v1159_v41 = vpop.f32.mrb[19].mxu1  ;;  %v1080_v7 = vadd.f32 %v1079_v34, %v2722_v39 }
 0x22e   : > { %v1325_v10 = vmul.bf16 %v1919_v33, %v2702_v35  ;;  %v2826_v59 = vadd.f32 %v1159_v41, %v2784_v37  ;;  %v1360_v17 = vunpack.c.l.bf16 %v1324_v28  ;;  %v1200_v51 = vpack.c.bf16 %v1078_v21, %v1074_v55  ;;  %v2832_v35 = vpop.permute.xlu1 %821  ;;  %v2834_v11 = vpop.permute.xlu0 %1293 }
 0x22f   : > { %v1201_v2 = vpack.c.bf16 %v1080_v7, %v1076_v54  ;;  %v1362_v61 = vunpack.c.h.bf16 %v1324_v28 }
 0x230   : > { %v1361_v9 = vunpack.c.l.bf16 %v1325_v10  ;;  %v1419_v24 = vadd.f32 %v1418_v0, %v1360_v17  ;;  %1924 = vtanh.bf16 %v1200_v51  ;;  %v1363_v39 = vunpack.c.h.bf16 %v1325_v10 }
 0x231   : > { %v1083_v12 = vpop.f32.mrb[20].mxu0  ;;  %v1163_v33 = vpop.f32.mrb[20].mxu1  ;;  %1926 = vtanh.bf16 %v1201_v2 }
 0x232   : > { %v1456_v37 = vadd.f32 %v1455_v44, %v1361_v9  ;;  %v1420_v55 = vadd.f32 %v1419_v24, %v1362_v61  ;;  %v1085_v21 = vpop.f32.mrb[21].mxu0  ;;  %v1165_v34 = vpop.f32.mrb[21].mxu1  ;;  %v1084_v7 = vadd.f32 %v1083_v12, %v2726_v20  ;;  %v2837_v23 = vadd.f32 %v1163_v33, %v812_v47 }
 0x233   : > { %v1921_v41 = vpop.eup %1920  ;;  %v1087_v0 = vpop.f32.mrb[22].mxu0  ;;  %v1086_v10 = vadd.f32 %v1085_v21, %v2726_v20 }
 0x234   : > { %v1457_v54 = vadd.f32 %v1456_v37, %v1363_v39  ;;  %v1167_v28 = vpop.f32.mrb[22].mxu1  ;;  %v1326_v51 = vmul.bf16 %v1921_v41, %v2714_v1  ;;  %v1088_v44 = vadd.f32 %v1087_v0, %v2700_v19  ;;  %v1089_v2 = vpop.f32.mrb[23].mxu0  ;;  %v2845_v39 = vadd.f32 %v1165_v34, %v812_v47 }
 0x235   : > { %v1923_v17 = vpop.eup %1922  ;;  %v2842_v9 = vadd.f32 %v1167_v28, %v817_v6  ;;  %v1169_v61 = vpop.f32.mrb[23].mxu1  ;;  %v1090_v37 = vadd.f32 %v1089_v2, %v2700_v19 }
 0x236   : > { %v1327_v24 = vmul.bf16 %v1923_v17, %v2714_v1  ;;  %v2848_v12 = vadd.f32 %v1169_v61, %v817_v6  ;;  %v1364_v33 = vunpack.c.l.bf16 %v1326_v51  ;;  %v1202_v15 = vpack.c.bf16 %v1088_v44, %v1084_v7  ;;  %v827_v38 = vpop.permute.xlu1 %826  ;;  %v2854_v1 = vpop.permute.xlu0 %1297 }
 0x237   : > { %v1203_v21 = vpack.c.bf16 %v1090_v37, %v1086_v10  ;;  %v1366_v28 = vunpack.c.h.bf16 %v1326_v51 }
 0x238   : > { %v1365_v20 = vunpack.c.l.bf16 %v1327_v24  ;;  %v1421_v25 = vadd.f32 %v1420_v55, %v1364_v33  ;;  %1928 = vtanh.bf16 %v1202_v15  ;;  %v1367_v47 = vunpack.c.h.bf16 %v1327_v24 }
 0x239   : > { %v1093_v6 = vpop.f32.mrb[24].mxu0  ;;  %v1173_v34 = vpop.f32.mrb[24].mxu1  ;;  %1930 = vtanh.bf16 %v1203_v21 }
 0x23a   : > { %v1458_v19 = vadd.f32 %v1457_v54, %v1365_v20  ;;  %v1422_v17 = vadd.f32 %v1421_v25, %v1366_v28  ;;  %v1095_v7 = vpop.f32.mrb[25].mxu0  ;;  %v1175_v44 = vpop.f32.mrb[25].mxu1  ;;  %v1094_v55 = vadd.f32 %v1093_v6, %v2704_v14 }
 0x23b   : > { %v1925_v2 = vpop.eup %1924  ;;  %v1097_v10 = vpop.f32.mrb[26].mxu0  ;;  %v1096_v54 = vadd.f32 %v1095_v7, %v2704_v14 }
 0x23c   : > { %v1459_v61 = vadd.f32 %v1458_v19, %v1367_v47  ;;  %v1177_v37 = vpop.f32.mrb[26].mxu1  ;;  %v1328_v0 = vmul.bf16 %v1925_v2, %v2718_v13  ;;  %v1098_v15 = vadd.f32 %v1097_v10, %v2708_v45  ;;  %v1099_v51 = vpop.f32.mrb[27].mxu0  ;;  %v2863_v19 = vadd.f32 %v1173_v34, %v2832_v35 }
 0x23d   : > { %v1179_v33 = vpop.f32.mrb[27].mxu1  ;;  %v1927_v24 = vpop.eup %1926  ;;  %v1100_v25 = vadd.f32 %v1099_v51, %v2708_v45  ;;  %v2866_v2 = vadd.f32 %v1175_v44, %v2832_v35  ;;  %v2868_v45 = vadd.f32 %v1177_v37, %v827_v38 }
 0x23e   : > { %v1368_v20 = vunpack.c.l.bf16 %v1328_v0  ;;  %v1329_v21 = vmul.bf16 %v1927_v24, %v2718_v13  ;;  %v1204_v28 = vpack.c.bf16 %v1098_v15, %v1094_v55  ;;  %v1370_v6 = vunpack.c.h.bf16 %v1328_v0  ;;  %v832_v5 = vpop.permute.xlu1 %831  ;;  %v837_v8 = vpop.permute.xlu0 %836 }
 0x23f   : > { %v1205_v47 = vpack.c.bf16 %v1100_v25, %v1096_v54  ;;  %v2870_v34 = vadd.f32 %v1179_v33, %v827_v38  ;;  %v1220_v44 = vpack.c.bf16 %v2868_v45, %v2863_v19 }
 0x240   : > { %v1423_v10 = vadd.f32 %v1422_v17, %v1368_v20  ;;  %v1369_v41 = vunpack.c.l.bf16 %v1329_v21  ;;  %1932 = vtanh.bf16 %v1204_v28  ;;  %v1371_v55 = vunpack.c.h.bf16 %v1329_v21 }
 0x241   : > { %1934 = vtanh.bf16 %v1205_v47  ;;  %v1103_v14 = vpop.f32.mrb[28].mxu0  ;;  %v1183_v7 = vpop.f32.mrb[28].mxu1 }
 0x242   : > { %v1424_v13 = vadd.f32 %v1423_v10, %v1370_v6  ;;  %v1460_v15 = vadd.f32 %v1459_v61, %v1369_v41  ;;  %v1105_v51 = vpop.f32.mrb[29].mxu0  ;;  %v1185_v24 = vpop.f32.mrb[29].mxu1  ;;  %v1104_v0 = vadd.f32 %v1103_v14, %v2712_v4  ;;  %v1221_v41 = vpack.c.bf16 %v2870_v34, %v2866_v2 }
 0x243   : > { %v1929_v35 = vpop.eup %1928  ;;  %v1107_v17 = vpop.f32.mrb[30].mxu0  ;;  %v1106_v33 = vadd.f32 %v1105_v51, %v2712_v4  ;;  %v2881_v47 = vadd.f32 %v1183_v7, %v832_v5  ;;  %1936 = vtanh.bf16 %v1208_v18  ;;  %v2892_v4 = vadd.f32 %v1185_v24, %v832_v5 }
 0x244   : > { %v1187_v54 = vpop.f32.mrb[30].mxu1  ;;  %v1461_v25 = vadd.f32 %v1460_v15, %v1371_v55  ;;  %v1330_v37 = vmul.bf16 %v1929_v35, %v2706_v3  ;;  %v1108_v20 = vadd.f32 %v1107_v17, %v2730_v52  ;;  %v1109_v28 = vpop.f32.mrb[31].mxu0  ;;  %1938 = vtanh.bf16 %v1209_v43 }
 0x245   : > { %v1189_v38 = vpop.f32.mrb[31].mxu1  ;;  %v1931_v61 = vpop.eup %1930  ;;  %v1110_v21 = vadd.f32 %v1109_v28, %v2730_v52  ;;  %v2883_v6 = vadd.f32 %v1187_v54, %v837_v8 }
 0x246   : > { %v1372_v10 = vunpack.c.l.bf16 %v1330_v37  ;;  %v1331_v14 = vmul.bf16 %v1931_v61, %v2706_v3  ;;  %v1206_v55 = vpack.c.bf16 %v1108_v20, %v1104_v0  ;;  %v1374_v52 = vunpack.c.h.bf16 %v1330_v37 }
 0x247   : > { %v1207_v15 = vpack.c.bf16 %v1110_v21, %v1106_v33  ;;  %v1222_v46 = vpack.c.bf16 %v2883_v6, %v2881_v47  ;;  %v2896_v3 = vadd.f32 %v1189_v38, %v837_v8  ;;  %v3056_v20 = vpack.c.bf16 %v2779_v58, %v2773_v30 }
 0x248   : > { %v1425_v7 = vadd.f32 %v1424_v13, %v1372_v10  ;;  %v1373_v51 = vunpack.c.l.bf16 %v1331_v14  ;;  %1940 = vtanh.bf16 %v1206_v55  ;;  %v1375_v18 = vunpack.c.h.bf16 %v1331_v14 }
 0x249   : > { %1942 = vtanh.bf16 %v1207_v15  ;;  %v1223_v5 = vpack.c.bf16 %v2896_v3, %v2892_v4  ;;  %v3054_v13 = vpack.c.bf16 %v2756_v36, %v2750_v31  ;;  %v3057_v21 = vpack.c.bf16 %v2799_v56, %v2791_v42 }
 0x24a   : > { %v1426_v22 = vadd.f32 %v1425_v7, %v1374_v52  ;;  %v1462_v35 = vadd.f32 %v1461_v25, %v1373_v51  ;;  %1944 = vtanh.bf16 %v3053_v32  ;;  %v3055_v25 = vpack.c.bf16 %v2776_v16, %v2770_v29 }
 0x24b   : > { %v1933_v0 = vpop.eup %1932  ;;  %1946 = vtanh.bf16 %v3054_v13  ;;  %v3058_v16 = vpack.c.bf16 %v2804_v63, %v2794_v60  ;;  %v3059_v42 = vpack.c.bf16 %v2820_v57, %v2811_v53  ;;  %v3060_v60 = vpack.c.bf16 %v2826_v59, %v2814_v26 }
 0x24c   : > { %v1935_v17 = vpop.eup %1934  ;;  %v1463_v40 = vadd.f32 %v1462_v35, %v1375_v18  ;;  %v1332_v43 = vmul.bf16 %v1933_v0, %v2710_v50  ;;  %1948 = vtanh.bf16 %v3055_v25  ;;  %v3061_v57 = vpack.c.bf16 %v2842_v9, %v2837_v23 }
 0x24d   : > { %v1333_v24 = vmul.bf16 %v1935_v17, %v2710_v50  ;;  %1950 = vtanh.bf16 %v3056_v20  ;;  %v3062_v59 = vpack.c.bf16 %v2848_v12, %v2845_v39 }
 0x24e   : > { %v1376_v8 = vunpack.c.l.bf16 %v1332_v43  ;;  %v1378_v48 = vunpack.c.h.bf16 %v1332_v43  ;;  %v1937_v37 = vpop.eup %1936  ;;  %1952 = vtanh.bf16 %v3057_v21  ;;  %v1302_v43 = vpop.permute.xlu1 %1301 }
 0x24f   : > { %v1377_v54 = vunpack.c.l.bf16 %v1333_v24  ;;  %v1379_v28 = vunpack.c.h.bf16 %v1333_v24  ;;  %v1939_v61 = vpop.eup %1938  ;;  %1954 = vtanh.bf16 %v3058_v16  ;;  %v1336_v58 = vmul.bf16 %v1937_v37, %v2782_v49 }
 0x250   : > { %v1427_v62 = vadd.f32 %v1426_v22, %v1376_v8  ;;  %v1337_v55 = vmul.bf16 %v1939_v61, %v2782_v49  ;;  %1956 = vtanh.bf16 %v3059_v42 }
 0x251   : > { %v1464_v38 = vadd.f32 %v1463_v40, %v1377_v54  ;;  %1958 = vtanh.bf16 %v3060_v60  ;;  %v1384_v51 = vunpack.c.l.bf16 %v1336_v58  ;;  %v1386_v53 = vunpack.c.h.bf16 %v1336_v58  ;;  %v1310_v58 = vpop.permute.xlu0 %1309 }
 0x252   : > { %v1428_v31 = vadd.f32 %v1427_v62, %v1378_v48  ;;  %v1385_v49 = vunpack.c.l.bf16 %v1337_v55  ;;  %1960 = vtanh.bf16 %v3061_v57  ;;  %v1387_v26 = vunpack.c.h.bf16 %v1337_v55 }
 0x253   : > { %v1941_v36 = vpop.eup %1940  ;;  %v1465_v33 = vadd.f32 %v1464_v38, %v1379_v28  ;;  %1962 = vtanh.bf16 %v3062_v59 }
 0x254   : > { %v1943_v50 = vpop.eup %1942  ;;  %v1334_v29 = vmul.bf16 %v1941_v36, %v2746_v27  ;;  %1964 = vtanh.bf16 %v1220_v44 }
 0x255   : > { %v1335_v30 = vmul.bf16 %v1943_v50, %v2746_v27  ;;  %v1945_v14 = vpop.eup %1944  ;;  %1966 = vtanh.bf16 %v1221_v41 }
 0x256   : > { %v1380_v10 = vunpack.c.l.bf16 %v1334_v29  ;;  %v1947_v52 = vpop.eup %1946  ;;  %v1382_v56 = vunpack.c.h.bf16 %v1334_v29  ;;  %v1338_v22 = vmul.bf16 %v1945_v14, %v2834_v11  ;;  %1968 = vtanh.bf16 %v1222_v46 }
 0x257   : > { %v1381_v15 = vunpack.c.l.bf16 %v1335_v30  ;;  %v1383_v63 = vunpack.c.h.bf16 %v1335_v30  ;;  %v1949_v35 = vpop.eup %1948  ;;  %v1339_v0 = vmul.bf16 %v1947_v52, %v2834_v11  ;;  %1970 = vtanh.bf16 %v1223_v5 }
 0x258   : > { %v1429_v7 = vadd.f32 %v1428_v31, %v1380_v10  ;;  %v1951_v32 = vpop.eup %1950  ;;  %v1388_v24 = vunpack.c.l.bf16 %v1338_v22  ;;  %v1340_v8 = vmul.bf16 %v1949_v35, %v2854_v1  ;;  %v1390_v23 = vunpack.c.h.bf16 %v1338_v22 }
 0x259   : > { %v1466_v27 = vadd.f32 %v1465_v33, %v1381_v15  ;;  %v1953_v11 = vpop.eup %1952  ;;  %v1389_v25 = vunpack.c.l.bf16 %v1339_v0  ;;  %v1341_v48 = vmul.bf16 %v1951_v32, %v2854_v1  ;;  %v1391_v39 = vunpack.c.h.bf16 %v1339_v0  ;;  %v1306_v1 = vpop.permute.xlu1 %1305 }
 0x25a   : > { %v1430_v18 = vadd.f32 %v1429_v7, %v1382_v56  ;;  %v1955_v37 = vpop.eup %1954  ;;  %v1342_v20 = vmul.bf16 %v1953_v11, %v1302_v43  ;;  %v1392_v28 = vunpack.c.l.bf16 %v1340_v8  ;;  %v1394_v21 = vunpack.c.h.bf16 %v1340_v8 }
 0x25b   : > { %v1467_v17 = vadd.f32 %v1466_v27, %v1383_v63  ;;  %v1957_v61 = vpop.eup %1956  ;;  %v1343_v31 = vmul.bf16 %v1955_v37, %v1302_v43  ;;  %v1393_v36 = vunpack.c.l.bf16 %v1341_v48  ;;  %v1395_v45 = vunpack.c.h.bf16 %v1341_v48 }
 0x25c   : > { %v1431_v40 = vadd.f32 %v1430_v18, %v1384_v51  ;;  %v1959_v50 = vpop.eup %1958  ;;  %v1396_v34 = vunpack.c.l.bf16 %v1342_v20  ;;  %v1344_v44 = vmul.bf16 %v1957_v61, %v1306_v1  ;;  %v1398_v55 = vunpack.c.h.bf16 %v1342_v20 }
 0x25d   : > { %v1468_v13 = vadd.f32 %v1467_v17, %v1385_v49  ;;  %v1961_v29 = vpop.eup %1960  ;;  %v1397_v16 = vunpack.c.l.bf16 %v1343_v31  ;;  %v1345_v30 = vmul.bf16 %v1959_v50, %v1306_v1  ;;  %v1399_v47 = vunpack.c.h.bf16 %v1343_v31  ;;  %v1314_v6 = vpop.permute.xlu1 %1313 }
 0x25e   : > { %v1432_v54 = vadd.f32 %v1431_v40, %v1386_v53  ;;  %v1963_v14 = vpop.eup %1962  ;;  %v1400_v52 = vunpack.c.l.bf16 %v1344_v44  ;;  %v1346_v42 = vmul.bf16 %v1961_v29, %v1310_v58  ;;  %v1402_v63 = vunpack.c.h.bf16 %v1344_v44 }
 0x25f   : > { %v1469_v62 = vadd.f32 %v1468_v13, %v1387_v26  ;;  %v1965_v4 = vpop.eup %1964  ;;  %v1401_v3 = vunpack.c.l.bf16 %v1345_v30  ;;  %v1347_v5 = vmul.bf16 %v1963_v14, %v1310_v58  ;;  %v1403_v51 = vunpack.c.h.bf16 %v1345_v30 }
 0x260   : > { %v1433_v9 = vadd.f32 %v1432_v54, %v1388_v24  ;;  %v1967_v60 = vpop.eup %1966  ;;  %v1404_v18 = vunpack.c.l.bf16 %v1346_v42  ;;  %v1348_v35 = vmul.bf16 %v1965_v4, %v1314_v6  ;;  %v1406_v26 = vunpack.c.h.bf16 %v1346_v42 }
 0x261   : > { %v1470_v12 = vadd.f32 %v1469_v62, %v1389_v25  ;;  %v1969_v0 = vpop.eup %1968  ;;  %v1405_v17 = vunpack.c.l.bf16 %v1347_v5  ;;  %v1349_v32 = vmul.bf16 %v1967_v60, %v1314_v6  ;;  %v1318_v57 = vpop.permute.xlu1 %1317  ;;  %v1407_v43 = vunpack.c.h.bf16 %v1347_v5 }
 0x262   : > { %v1434_v38 = vadd.f32 %v1433_v9, %v1390_v23  ;;  %v1971_v40 = vpop.eup %1970  ;;  %v1408_v24 = vunpack.c.l.bf16 %v1348_v35  ;;  %v1350_v54 = vmul.bf16 %v1969_v0, %v1318_v57  ;;  %v1410_v62 = vunpack.c.h.bf16 %v1348_v35 }
 0x263   : > { %v1471_v33 = vadd.f32 %v1470_v12, %v1391_v39  ;;  %v1409_v11 = vunpack.c.l.bf16 %v1349_v32  ;;  %v1351_v48 = vmul.bf16 %v1971_v40, %v1318_v57  ;;  %v1411_v23 = vunpack.c.h.bf16 %v1349_v32  ;;  %v3063_v40 = vld [vmem:[#allocation15_spill] sm:$0xff] }
 0x264   : > { %v1435_v19 = vadd.f32 %v1434_v38, %v1392_v28  ;;  %v1412_v12 = vunpack.c.l.bf16 %v1350_v54  ;;  %v1414_v38 = vunpack.c.h.bf16 %v1350_v54  ;;  %v3064_v54 = vlaneseq }
 0x265   : > { %v1472_v2 = vadd.f32 %v1471_v33, %v1393_v36  ;;  %v1413_v28 = vunpack.c.l.bf16 %v1351_v48  ;;  %v1415_v31 = vunpack.c.h.bf16 %v1351_v48 }
 0x266   : > { %v1436_v41 = vadd.f32 %v1435_v19, %v1394_v21  ;;  %vm1545_vm4 = vcmp.lt.s32.totalorder %v3064_v54, 256 }
 0x267   : > { %v1473_v10 = vadd.f32 %v1472_v2, %v1395_v45 }
 0x268   : > { %v1437_v15 = vadd.f32 %v1436_v41, %v1396_v34 }
 0x269   : > { %v1474_v46 = vadd.f32 %v1473_v10, %v1397_v16  ;;  %v1493_v16 = vpop.permute.xlu0 %1492 }
 0x26a   : > { %v1438_v56 = vadd.f32 %v1437_v15, %v1398_v55 }
 0x26b   : > { %v1475_v7 = vadd.f32 %v1474_v46, %v1399_v47 }
 0x26c   : > { %v1439_v27 = vadd.f32 %v1438_v56, %v1400_v52 }
 0x26d   : > { %v1476_v22 = vadd.f32 %v1475_v7, %v1401_v3  ;;  %v2050_v7 = vmov 1966171168  }
 0x26e   : > { %v1440_v49 = vadd.f32 %v1439_v27, %v1402_v63  ;;  %v1529_v60 = vunpack.c.l.s4 %v2050_v7 }
 0x26f   : > { %v1477_v53 = vadd.f32 %v1476_v22, %v1403_v51 }
 0x270   : > { %v1441_v59 = vadd.f32 %v1440_v49, %v1404_v18  ;;  %v1530_v35 = vunpack.c.0.s8 %v1529_v60 }
 0x271   : > { %v1478_v13 = vadd.f32 %v1477_v53, %v1405_v17 }
 0x272   : > { %v1442_v8 = vadd.f32 %v1441_v59, %v1406_v26  ;;  %v1533_v26 = vsub.s32 %v1530_v35, %v3063_v40 }
 0x273   : > { %v1479_v25 = vadd.f32 %v1478_v13, %v1407_v43 }
 0x274   : > { %v1443_v37 = vadd.f32 %v1442_v8, %v1408_v24 }
 0x275   : > { %v1480_v9 = vadd.f32 %v1479_v25, %v1409_v11 }
 0x276   : > { %v1444_v39 = vadd.f32 %v1443_v37, %v1410_v62 }
 0x277   : > { %v1481_v20 = vadd.f32 %v1480_v9, %v1411_v23 }
 0x278   : > { %v1445_v61 = vadd.f32 %v1444_v39, %v1412_v12 }
 0x279   : > { %v1482_v1 = vadd.f32 %v1481_v20, %v1413_v28 }
 0x27a   : > { %v1446_v36 = vadd.f32 %v1445_v61, %v1414_v38 }
 0x27b   : > { %v1483_v33 = vadd.f32 %v1482_v1, %v1415_v31 }
 0x27c   : > { %v1447_v50 = vrot.slane %v1446_v36, 4 }
 0x27d   : > { %v1484_v21 = vrot.slane %v1483_v33, 4 }
 0x27e   : > { %v1448_v19 = vadd.f32 %v1447_v50, %v1446_v36 }
 0x27f   : > { %v1485_v45 = vadd.f32 %v1484_v21, %v1483_v33 }
 0x280   : > { %v1449_v2 = vrot.slane %v1448_v19, 2 }
 0x281   : > { %v1486_v34 = vrot.slane %v1485_v45, 2 }
 0x282   : > { %v1450_v44 = vadd.f32 %v1449_v2, %v1448_v19 }
 0x283   : > { %v1487_v41 = vadd.f32 %v1486_v34, %v1485_v45 }
 0x284   : > { %v1451_v29 = vrot.slane %v1450_v44, 1 }
 0x285   : > { %v1488_v30 = vrot.slane %v1487_v41, 1 }
 0x286   : > { %v1452_v58 = vadd.f32 %v1451_v29, %v1450_v44 }
 0x287   : > { %v1489_v10 = vadd.f32 %v1488_v30, %v1487_v41 }
 0x288   : > { %v1495_v14 = vadd.f32 %v1493_v16, %v1452_v58 }
 0x289   : > { %v1496_v55 = vadd.f32 %v1493_v16, %v1489_v10 }
 0x28a   : > { %v1499_v15 = vmin.f32 %v1495_v14, 20.0  ;;  %vm1497_vm1 = vcmp.gt.f32.partialorder %v1495_v14, 20.0 }
 0x28b   : > { %v1500_v47 = vmin.f32 %v1496_v55, 20.0  ;;  %vm1498_vm3 = vcmp.gt.f32.partialorder %v1496_v55, 20.0 }
 0x28c   : > { %v1501_v6 = vmul.f32 1.442695, %v1499_v15 }
 0x28d   : > { %v1503_v46 = vmul.f32 1.442695, %v1500_v47 }
 0x28e   : > { %1972 = vpow2.f32 %v1501_v6 }
 0x28f   : > { %1974 = vpow2.f32 %v1503_v46 }
 0x298   : > { %v1973_v52 = vpop.eup %1972 }
 0x299   : > { %v1975_v42 = vpop.eup %1974  ;;  %v1505_v56 = vadd.f32 1.0, %v1973_v52  ;;  %v1508_v3 = vmul.f32 -0.5, %v1973_v52  ;;  %v1511_v27 = vand.u32 2147483647, %v1973_v52 }
 0x29a   : > { %v1514_v4 = vadd.f32 1.0, %v1975_v42  ;;  %v1517_v5 = vmul.f32 -0.5, %v1975_v42  ;;  %v1520_v22 = vand.u32 2147483647, %v1975_v42 }
 0x29b   : > { %1976 = vlog2.f32 %v1505_v56  ;;  %v1509_v63 = vadd.f32 1.0, %v1508_v3  ;;  %vm1512_vm0 = vcmp.lt.f32.partialorder %v1511_v27, 0.0004427343 }
 0x29c   : > { %1978 = vlog2.f32 %v1514_v4  ;;  %v1518_v51 = vadd.f32 1.0, %v1517_v5  ;;  %vm1521_vm2 = vcmp.lt.f32.partialorder %v1520_v22, 0.0004427343 }
 0x29d   : > { %v1510_v17 = vmul.f32 %v1973_v52, %v1509_v63 }
 0x29e   : > { %v1519_v53 = vmul.f32 %v1975_v42, %v1518_v51 }
 0x2a5   : > { %v1977_v18 = vpop.eup %1976 }
 0x2a6   : > { %v1979_v49 = vpop.eup %1978  ;;  %v1507_v0 = vmul.f32 0.6931472, %v1977_v18 }
 0x2a7   : > { %v1516_v32 = vmul.f32 0.6931472, %v1979_v49 }
 0x2a8   : > { %v1513_v57 = vsel %vm1512_vm0, %v1510_v17, %v1507_v0 }
 0x2a9   : > { %v1522_v59 = vsel %vm1521_vm2, %v1519_v53, %v1516_v32  ;;  %v1523_v43 = vsel %vm1497_vm1, %v1495_v14, %v1513_v57 }
 0x2aa   : > { %v1524_v13 = vsel %vm1498_vm3, %v1496_v55, %v1522_v59 }
 0x2ab   : > { %v1527_v24 = vcombine.low %v1523_v43, %v1524_v13 }
 0x2ad   : > { %v1534_v8 = vrot.slane %v1527_v24, %v1533_v26 }
 0x2af   : > { %v1541_v11 = vrot.slane %v1534_v8, %v1533_v26 }
 0x2b1   : > { %1547 = vst.msk [vmem:[%s162_s8] sm:$0x3] %vm1545_vm4, %v1541_v11 }
 0x2b2   : > { %1993 = shalt.err (!%p1990_p3)
}
 0x2b3   : > { %s1994_s26 = scalar_lea.hbm %s2959_s17, 32  ;;  %s1998_s29 = scalar_lea.hbm %s3004_s3, 64 }
 0x2b4   : > { %p1995_p4 = scmp.ne.s32.totalorder %s2959_s17, %s1994_s26  ;;  %p1999_p9 = scmp.lt.u32.totalorder %s2959_s17, %s3004_s3 }
 0x2b5   : > { %p2000_p10 = scmp.lt.u32.totalorder %s1998_s29, %s1994_s26  ;;  %p2002_p12 = scmp.lt.u32.totalorder %s1994_s26, %s2959_s17 }
 0x2b6   : > { %p1996_p7 = pnand %p1995_p4, %p2110_p5 }
 0x2b7   : > { %p2001_p11 = por %p2000_p10, %p1999_p9 }
 0x2b8   : > { %p1997_p8 = pneg %p1996_p7 }
 0x2b9   : > { %p2003_p13 = por %p2002_p12, %p2001_p11 }
 0x2bb   : > { %p2004_p0 = pnand %p2003_p13, %p1997_p8 }
 0x2bd   : > { %2007 = shalt.err (!%p2004_p0)
}
 0x2be   : > { %1695 = dma.vmem_to_hbm [thread:$0]  (%p2110_p5), %s2961_s9, 32, %s2959_s17, %s1549_s19  }
 0x2bf PF: > { %p1701_p1 = scmp.ge.s32.totalorder %s2042_s15, 2  ;;  %s1575_s5 = sand.u32 1, %s2030_s12  }
 0x2c0   : > { %s1576_s6 = scalar_lea.sflag [#allocation3], %s1575_s5 }
 0x2c1   : > { %p1698_p2 = pnand %p1701_p1, %p2114_p6 }
 0x2c3   : > { %2025 = dma.done.wait (!%p1698_p2), %s1576_s6, 32  }
 0x2c4   : > { %2027 = vsyncadd (!%p1698_p2), %s1576_s6, 4294967264  ;;  %p13_p3 = scmp.ge.s32.totalorder %s2097_s18, 4   ;;  %s3065_s12 = smov %s2034_s13 }
 0x2c5   : > { %s3066_s13 = smov %s2038_s14  ;;  %s3067_s14 = smov %s2108_s21 }
 0x2c6   : > { %s3068_s15 = smov %s2097_s18  ;;  %15 = sbr.rel (!%p13_p3) target bundleno = 3 (0x3), region = 67 }
 0x2cd   :  { %1581 = vsyncpa [#allocation3], 1 }
 0x2ce   :  { %1583 = vsyncpa [#allocation3 + $0x1], 1 }

</bundles_post_ra>
